<compile_context>
chip_gen: v6e
topology: v6e:2x2x1
jax: 0.10.0
libtpu: 0.0.40
codegen_flags: <defaults>
</compile_context>

<pallas_src>
import jax
import jax.numpy as jnp
from jax.experimental import pallas as pl
from jax.experimental.pallas import tpu as pltpu

# ----------------------------- model config ---------------------------------
IN_CHANNELS = 8        # embedding dim / first conv input channels
KERNEL_SIZE = 3
NB_FILTERS  = 8
NB_LAYERS   = 2
NUM_TYPES   = 5
H1 = H2 = H3 = 16      # hidden sizes of the MLP kernel
DILATIONS   = [2 ** i for i in range(NB_LAYERS)]       # [1, 2]

ROW_TILE = 2048        # rows (event positions) per grid step, on the lane axis


def _round_up(x, m):
    return (x + m - 1) // m * m


# ----------------------------- Pallas kernel --------------------------------
def cont_conv_kernel(fgd_ref, feat_ref, ipos_ref, phase_ref,
                     w1t_ref, b1t_ref, w2t_ref, b2t_ref, w3rt_ref, b3rt_ref,
                     w4rt_ref, b4rt_ref, wskipt_ref, bskipt_ref,
                     out_ref):
    """One continuous-conv layer for a tile of TM rows (channel-major layout).

    fgd_ref : (K, c_in+1, TM)  per tap [gathered features ; time lag], invalid taps zeroed
    feat_ref: (c_in, TM)       features at the current position (skip path)
    out_ref : (c_out, TM)
    Weights are pre-transposed to (out, contract): every matmul is
    (out, contract) @ (contract, TM) -> lane-dense results, unmasked stores.
    """
    n_taps = fgd_ref.shape[0]
    c_in = feat_ref.shape[0]
    tm = feat_ref.shape[1]
    h3c = w3rt_ref.shape[0]            # H3 * c_in (128)
    reps = h3c // c_in

    ipos = ipos_ref[...]               # (c_in, 1)  reciprocal sinusoidal divisors
    phase = phase_ref[...]             # (c_in, 1)  0 on even channels, pi/2 on odd

    # 1x1-conv skip connection
    acc = jnp.dot(wskipt_ref[...], feat_ref[...],
                  preferred_element_type=jnp.float32) + bskipt_ref[...]   # (c_out, TM)

    # Sinusoidal temporal encoding of all K lags, batched along lanes.
    # sin(x + pi/2) == cos(x) -> one transcendental instead of sin+cos+select.
    scaled = jnp.concatenate(
        [fgd_ref[k, c_in:c_in + 1, :] * ipos + phase for k in range(n_taps)],
        axis=-1)                                                          # (c_in, K*TM)
    te = jnp.sin(scaled)

    # MLP kernel: one GEMM per stage for all K taps (3x fewer launches).
    # w3r/b3r are pre-folded with a column-replication matrix so
    # hr[j*c_in + i, m] == relu(w3 @ h2 + b3)[j, m].
    h = jnp.maximum(jnp.dot(w1t_ref[...], te,
                            preferred_element_type=jnp.float32) + b1t_ref[...], 0.0)
    h = jnp.maximum(jnp.dot(w2t_ref[...], h,
                            preferred_element_type=jnp.float32) + b2t_ref[...], 0.0)
    hr = jnp.maximum(jnp.dot(w3rt_ref[...], h,
                             preferred_element_type=jnp.float32) + b3rt_ref[...], 0.0)  # (H3*c_in, K*TM)

    # Bilinear contraction with tap-sum fusion (w4r/b4r are tap-invariant):
    #   out[o, m] += sum_{j,i} (sum_k h3_k[j,m] * fk_k[i,m]) * W4[j,i,o]
    #              + sum_i    (sum_k fk_k[i,m])             * B4[i,o]
    g_sum = None
    f_sum = None
    for k in range(n_taps):            # static unroll over kernel taps (K = 3)
        fk = fgd_ref[k, :c_in, :]                               # (c_in, TM), masked
        gk = hr[:, k * tm:(k + 1) * tm] * jnp.tile(fk, (reps, 1))
        g_sum = gk if g_sum is None else g_sum + gk
        f_sum = fk if f_sum is None else f_sum + fk
    acc = acc + jnp.dot(w4rt_ref[...], g_sum, preferred_element_type=jnp.float32)
    acc = acc + jnp.dot(b4rt_ref[...], f_sum, preferred_element_type=jnp.float32)

    # LeakyReLU(0.1) applied by CCNN.forward
    out_ref[...] = jnp.where(acc >= 0.0, acc, 0.1 * acc).astype(out_ref.dtype)


def cont_conv_layer(fgd, feat, p):
    """fgd: (K, c_in+1, M) f32, feat: (c_in, M) f32 -> (c_out, M) f32 (channel-major)."""
    K, cfd, M = fgd.shape
    c_in = feat.shape[0]
    c_out = p["wskipt"].shape[0]

    # Row tile on the lane axis (multiple of 128); cap at ceil(M/2) so the grid
    # has >= 2 steps when possible (keeps v7x's second TensorCore busy).
    tm = min(ROW_TILE, max(128, _round_up((M + 1) // 2, 128)))
    m_pad = _round_up(M, tm)
    if m_pad != M:
        fgd = jnp.pad(fgd, ((0, 0), (0, 0), (0, m_pad - M)))
        feat = jnp.pad(feat, ((0, 0), (0, m_pad - M)))

    def param_spec(a):
        return pl.BlockSpec(a.shape, lambda i: (0, 0))

    in_specs = [
        pl.BlockSpec((K, cfd, tm), lambda i: (0, 0, i)),   # fgd slab (all taps)
        pl.BlockSpec((c_in, tm), lambda i: (0, i)),        # skip-path features
        param_spec(p["ipos"]), param_spec(p["phase"]),
        param_spec(p["w1t"]), param_spec(p["b1t"]),
        param_spec(p["w2t"]), param_spec(p["b2t"]),
        param_spec(p["w3rt"]), param_spec(p["b3rt"]),
        param_spec(p["w4rt"]), param_spec(p["b4rt"]),
        param_spec(p["wskipt"]), param_spec(p["bskipt"]),
    ]

    out = pl.pallas_call(
        cont_conv_kernel,
        out_shape=jax.ShapeDtypeStruct((c_out, m_pad), jnp.float32),
        grid_spec=pltpu.PrefetchScalarGridSpec(
            num_scalar_prefetch=0,
            grid=(m_pad // tm,),
            in_specs=in_specs,
            out_specs=pl.BlockSpec((c_out, tm), lambda i: (0, i)),
        ),
        compiler_params=pltpu.CompilerParams(dimension_semantics=("parallel",)),
    )(fgd, feat, p["ipos"], p["phase"],
      p["w1t"], p["b1t"], p["w2t"], p["b2t"], p["w3rt"], p["b3rt"],
      p["w4rt"], p["b4rt"], p["wskipt"], p["bskipt"])
    return out[:, :M]


# ----------------------------- JAX glue --------------------------------------
def build_conv_inputs(times, feats_cm, non_pad_mask, kernel_size, dilation):
    """Build the channel-major (K, c_in+1, M) slab [gathered features ; time lag].

    include_zero_lag=True: tap j=0 is the current position (zero lag).
    Invalid taps (shift past sequence start or padding) are zeroed.
    feats_cm: (c_in, bs, L) channel-major features.
    """
    c_in, bs, L = feats_cm.shape
    pos = jnp.arange(L)
    slabs = []
    for j in range(kernel_size):
        shift = j * dilation
        src_valid = (pos >= shift)[None, :]                  # (1, L)
        t_shift = jnp.roll(times, shift, axis=1)
        f_shift = jnp.roll(feats_cm, shift, axis=2)
        m_shift = jnp.roll(non_pad_mask, shift, axis=1)
        valid = src_valid & m_shift & non_pad_mask           # (bs, L)
        dt = jnp.where(valid, times - t_shift, 0.0)          # (bs, L)
        fg = jnp.where(valid[None], f_shift, 0.0)            # (c_in, bs, L)
        slab = jnp.concatenate([fg, dt[None]], axis=0)       # (c_in+1, bs, L)
        slabs.append(slab.reshape(c_in + 1, bs * L))
    return jnp.stack(slabs, axis=0).astype(jnp.float32)      # (K, c_in+1, M)


def prep_conv_params(p, c_in, c_out):
    """Restructure MLP-kernel weights for the channel-major bilinear contraction."""
    h3 = p["w3"].shape[1]
    cols = jnp.arange(h3 * c_in)[None, :]
    # replication: rep[j, j*c_in + i] = 1  -> folds repeat(h3, c_in) into w3/b3
    rep = (cols // c_in == jnp.arange(h3)[:, None]).astype(jnp.float32)
    ch = jnp.arange(c_in)
    phase = jnp.where(ch % 2 == 0, 0.0, jnp.pi / 2.0).astype(jnp.float32)[:, None]
    return dict(
        w1t=p["w1"].T, b1t=p["b1"].T,                         # (H1, c_in), (H1, 1)
        w2t=p["w2"].T, b2t=p["b2"].T,                         # (H2, H1),   (H2, 1)
        w3rt=(p["w3"] @ rep).T,                               # (H3*c_in, H2)
        b3rt=(p["b3"] @ rep).T,                               # (H3*c_in, 1)
        w4rt=p["w4"].reshape(h3 * c_in, c_out).T,             # (c_out, H3*c_in)
        b4rt=p["b4"].reshape(c_in, c_out).T,                  # (c_out, c_in)
        wskipt=p["wskip"].T, bskipt=p["bskip"].T,             # (c_out, c_in), (c_out, 1)
        ipos=(1.0 / p["posv"]).T,                             # (c_in, 1)
        phase=phase,                                          # (c_in, 1)
    )


def ccnn_forward(event_times, event_types, emb, conv_params):
    bs, L = event_times.shape
    # __add_bos: prepend t=0 / type = max_type + 1
    event_times = jnp.concatenate(
        [jnp.zeros((bs, 1), event_times.dtype), event_times], axis=1)
    max_type = jnp.max(event_types) + 1
    bos = jnp.full((bs, 1), 1, dtype=event_types.dtype) * max_type
    event_types = jnp.concatenate([bos, event_types], axis=1)

    # Matches the reference: mask computed AFTER BOS insertion (BOS time == 0,
    # so the BOS position is treated as padding, exactly like the PyTorch code).
    non_pad_mask = event_times != 0
    enc = emb[event_types].astype(jnp.float32)                # (bs, L+1, C_in)
    enc_cm = jnp.transpose(enc, (2, 0, 1))                    # (C_in, bs, L+1) channel-major

    L1 = L + 1
    M = bs * L1
    for layer_idx, p in enumerate(conv_params):
        c_in = enc_cm.shape[0]
        pp = prep_conv_params(p, c_in, NB_FILTERS)
        fgd = build_conv_inputs(event_times, enc_cm, non_pad_mask,
                                KERNEL_SIZE, DILATIONS[layer_idx])   # (K, c_in+1, M)
        feat_m = enc_cm.reshape(c_in, M)
        out = cont_conv_layer(fgd, feat_m, pp)                 # (C_out, M), leaky-relu'd
        enc_cm = out.reshape(NB_FILTERS, bs, L1)
    return jnp.transpose(enc_cm, (1, 2, 0))                    # (bs, L+1, C_out)


# ----------------------------- parameter init --------------------------------
def _uniform(key, shape):
    fan_in = shape[0]
    lim = 1.0 / (fan_in ** 0.5)
    return jax.random.uniform(key, shape, jnp.float32, -lim, lim)


def init_params(key):
    keys = iter(jax.random.split(key, 64))
    emb = 0.1 * jax.random.normal(next(keys), (NUM_TYPES + 2, IN_CHANNELS), jnp.float32)
    emb = emb.at[0].set(0.0)                                  # padding_idx = 0
    c_ins = [IN_CHANNELS] + [NB_FILTERS] * NB_LAYERS
    convs = []
    for i in range(NB_LAYERS):
        c_in, c_out = c_ins[i], NB_FILTERS
        posv = jnp.array([[10000.0 ** (2.0 * (j // 2) / c_in) for j in range(c_in)]],
                         dtype=jnp.float32)
        convs.append(dict(
            w1=_uniform(next(keys), (c_in, H1)), b1=_uniform(next(keys), (1, H1)),
            w2=_uniform(next(keys), (H1, H2)),   b2=_uniform(next(keys), (1, H2)),
            w3=_uniform(next(keys), (H2, H3)),   b3=_uniform(next(keys), (1, H3)),
            w4=_uniform(next(keys), (H3, c_in * c_out)),
            b4=_uniform(next(keys), (1, c_in * c_out)),
            wskip=_uniform(next(keys), (c_in, c_out)),
            bskip=_uniform(next(keys), (1, c_out)),
            posv=posv,
        ))
    return emb, convs


# ----------------------------- main ------------------------------------------
if __name__ == "__main__":
    key = jax.random.PRNGKey(0)
    k_t, k_y, k_p = jax.random.split(key, 3)

    bs, L = 2, 7
    gaps = jax.random.uniform(k_t, (bs, L), minval=0.1, maxval=1.0)
    event_times = jnp.cumsum(gaps, axis=1).astype(jnp.float32)
    event_types = jax.random.randint(k_y, (bs, L), 1, NUM_TYPES + 1)

    # pad the tail of the second sequence (length 5) with zeros
    lengths = jnp.array([[L], [5]])
    pad = jnp.arange(L)[None, :] >= lengths
    event_times = jnp.where(pad, 0.0, event_times)
    event_types = jnp.where(pad, 0, event_types).astype(jnp.int32)

    emb, conv_params = init_params(k_p)

    out = jax.jit(ccnn_forward)(event_times, event_types, emb, conv_params)
    out = jax.block_until_ready(out)
    assert out.shape == (bs, L + 1, NB_FILTERS)
    assert jnp.all(jnp.isfinite(out))
    print("KERNEL_OK")
</pallas_src>

<mosaic_0001>
module attributes {stable_mosaic.version = 11 : i64} {
  func.func @cont_conv_kernel(%arg0: i32, %arg1: memref<3x9x128xf32, #tpu.memory_space<vmem>>, %arg2: memref<8x128xf32, #tpu.memory_space<vmem>>, %arg3: memref<8x1xf32, #tpu.memory_space<vmem>>, %arg4: memref<8x1xf32, #tpu.memory_space<vmem>>, %arg5: memref<16x8xf32, #tpu.memory_space<vmem>>, %arg6: memref<16x1xf32, #tpu.memory_space<vmem>>, %arg7: memref<16x16xf32, #tpu.memory_space<vmem>>, %arg8: memref<16x1xf32, #tpu.memory_space<vmem>>, %arg9: memref<128x16xf32, #tpu.memory_space<vmem>>, %arg10: memref<128x1xf32, #tpu.memory_space<vmem>>, %arg11: memref<8x128xf32, #tpu.memory_space<vmem>>, %arg12: memref<8x8xf32, #tpu.memory_space<vmem>>, %arg13: memref<8x8xf32, #tpu.memory_space<vmem>>, %arg14: memref<8x1xf32, #tpu.memory_space<vmem>>, %arg15: memref<8x128xf32, #tpu.memory_space<vmem>>) attributes {dimension_semantics = [#tpu.dimension_semantics<parallel>], iteration_bounds = array<i64: 1>, scalar_prefetch = 0 : i64, scratch_operands = 0 : i64, tpu.core_type = #tpu.core_type<tc>, window_params = [{transform_indices = @transform_0, window_bounds = array<i64: 3, 9, 128>}, {transform_indices = @transform_1, window_bounds = array<i64: 8, 128>}, {pipeline_mode = #tpu.pipeline_mode<synchronous>, transform_indices = @transform_2, window_bounds = array<i64: 8, 1>}, {pipeline_mode = #tpu.pipeline_mode<synchronous>, transform_indices = @transform_3, window_bounds = array<i64: 8, 1>}, {pipeline_mode = #tpu.pipeline_mode<synchronous>, transform_indices = @transform_4, window_bounds = array<i64: 16, 8>}, {pipeline_mode = #tpu.pipeline_mode<synchronous>, transform_indices = @transform_5, window_bounds = array<i64: 16, 1>}, {pipeline_mode = #tpu.pipeline_mode<synchronous>, transform_indices = @transform_6, window_bounds = array<i64: 16, 16>}, {pipeline_mode = #tpu.pipeline_mode<synchronous>, transform_indices = @transform_7, window_bounds = array<i64: 16, 1>}, {pipeline_mode = #tpu.pipeline_mode<synchronous>, transform_indices = @transform_8, window_bounds = array<i64: 128, 16>}, {pipeline_mode = #tpu.pipeline_mode<synchronous>, transform_indices = @transform_9, window_bounds = array<i64: 128, 1>}, {pipeline_mode = #tpu.pipeline_mode<synchronous>, transform_indices = @transform_10, window_bounds = array<i64: 8, 128>}, {pipeline_mode = #tpu.pipeline_mode<synchronous>, transform_indices = @transform_11, window_bounds = array<i64: 8, 8>}, {pipeline_mode = #tpu.pipeline_mode<synchronous>, transform_indices = @transform_12, window_bounds = array<i64: 8, 8>}, {pipeline_mode = #tpu.pipeline_mode<synchronous>, transform_indices = @transform_13, window_bounds = array<i64: 8, 1>}, {transform_indices = @transform_14, window_bounds = array<i64: 8, 128>}]} {
    %c0 = arith.constant 0 : index
    %c0_0 = arith.constant 0 : index
    %0 = vector.load %arg3[%c0, %c0_0] : memref<8x1xf32, #tpu.memory_space<vmem>>, vector<8x1xf32>
    %c0_1 = arith.constant 0 : index
    %c0_2 = arith.constant 0 : index
    %1 = vector.load %arg4[%c0_1, %c0_2] : memref<8x1xf32, #tpu.memory_space<vmem>>, vector<8x1xf32>
    %c0_3 = arith.constant 0 : index
    %c0_4 = arith.constant 0 : index
    %2 = vector.load %arg13[%c0_3, %c0_4] : memref<8x8xf32, #tpu.memory_space<vmem>>, vector<8x8xf32>
    %c0_5 = arith.constant 0 : index
    %c0_6 = arith.constant 0 : index
    %3 = vector.load %arg2[%c0_5, %c0_6] : memref<8x128xf32, #tpu.memory_space<vmem>>, vector<8x128xf32>
    %cst = arith.constant dense<0.000000e+00> : vector<8x128xf32>
    %4 = tpu.matmul %2, %3, %cst {dimension_numbers = #tpu.dot_dimension_numbers<[1], [0], [0], [1], [0, 0, 1, 1], [], []>} : vector<8x8xf32>, vector<8x128xf32>, vector<8x128xf32> -> vector<8x128xf32>
    %c0_7 = arith.constant 0 : index
    %c0_8 = arith.constant 0 : index
    %5 = vector.load %arg14[%c0_7, %c0_8] : memref<8x1xf32, #tpu.memory_space<vmem>>, vector<8x1xf32>
    %6 = vector.broadcast %5 : vector<8x1xf32> to vector<8x128xf32>
    %7 = arith.addf %4, %6 : vector<8x128xf32>
    %c0_9 = arith.constant 0 : index
    %c8 = arith.constant 8 : index
    %c0_10 = arith.constant 0 : index
    %8 = vector.load %arg1[%c0_9, %c8, %c0_10] : memref<3x9x128xf32, #tpu.memory_space<vmem>>, vector<1x1x128xf32>
    %9 = vector.shape_cast %8 : vector<1x1x128xf32> to vector<1x128xf32>
    %10 = vector.broadcast %9 : vector<1x128xf32> to vector<8x128xf32>
    %11 = vector.broadcast %0 : vector<8x1xf32> to vector<8x128xf32>
    %12 = arith.mulf %10, %11 : vector<8x128xf32>
    %13 = vector.broadcast %1 : vector<8x1xf32> to vector<8x128xf32>
    %14 = arith.addf %12, %13 : vector<8x128xf32>
    %c1 = arith.constant 1 : index
    %c8_11 = arith.constant 8 : index
    %c0_12 = arith.constant 0 : index
    %15 = vector.load %arg1[%c1, %c8_11, %c0_12] : memref<3x9x128xf32, #tpu.memory_space<vmem>>, vector<1x1x128xf32>
    %16 = vector.shape_cast %15 : vector<1x1x128xf32> to vector<1x128xf32>
    %17 = vector.broadcast %16 : vector<1x128xf32> to vector<8x128xf32>
    %18 = vector.broadcast %0 : vector<8x1xf32> to vector<8x128xf32>
    %19 = arith.mulf %17, %18 : vector<8x128xf32>
    %20 = vector.broadcast %1 : vector<8x1xf32> to vector<8x128xf32>
    %21 = arith.addf %19, %20 : vector<8x128xf32>
    %c2 = arith.constant 2 : index
    %c8_13 = arith.constant 8 : index
    %c0_14 = arith.constant 0 : index
    %22 = vector.load %arg1[%c2, %c8_13, %c0_14] : memref<3x9x128xf32, #tpu.memory_space<vmem>>, vector<1x1x128xf32>
    %23 = vector.shape_cast %22 : vector<1x1x128xf32> to vector<1x128xf32>
    %24 = vector.broadcast %23 : vector<1x128xf32> to vector<8x128xf32>
    %25 = vector.broadcast %0 : vector<8x1xf32> to vector<8x128xf32>
    %26 = arith.mulf %24, %25 : vector<8x128xf32>
    %27 = vector.broadcast %1 : vector<8x1xf32> to vector<8x128xf32>
    %28 = arith.addf %26, %27 : vector<8x128xf32>
    %29 = tpu.concatenate %14, %21, %28 in 1 : vector<8x128xf32>, vector<8x128xf32>, vector<8x128xf32> -> vector<8x384xf32>
    %30 = math.sin %29 : vector<8x384xf32>
    %c0_15 = arith.constant 0 : index
    %c0_16 = arith.constant 0 : index
    %31 = vector.load %arg5[%c0_15, %c0_16] : memref<16x8xf32, #tpu.memory_space<vmem>>, vector<16x8xf32>
    %cst_17 = arith.constant dense<0.000000e+00> : vector<16x384xf32>
    %32 = tpu.matmul %31, %30, %cst_17 {dimension_numbers = #tpu.dot_dimension_numbers<[1], [0], [0], [1], [0, 0, 1, 1], [], []>} : vector<16x8xf32>, vector<8x384xf32>, vector<16x384xf32> -> vector<16x384xf32>
    %c0_18 = arith.constant 0 : index
    %c0_19 = arith.constant 0 : index
    %33 = vector.load %arg6[%c0_18, %c0_19] : memref<16x1xf32, #tpu.memory_space<vmem>>, vector<16x1xf32>
    %34 = vector.broadcast %33 : vector<16x1xf32> to vector<16x384xf32>
    %35 = arith.addf %32, %34 : vector<16x384xf32>
    %cst_20 = arith.constant 0.000000e+00 : f32
    %36 = vector.broadcast %cst_20 : f32 to vector<16x384xf32>
    %37 = arith.maximumf %35, %36 : vector<16x384xf32>
    %c0_21 = arith.constant 0 : index
    %c0_22 = arith.constant 0 : index
    %38 = vector.load %arg7[%c0_21, %c0_22] : memref<16x16xf32, #tpu.memory_space<vmem>>, vector<16x16xf32>
    %cst_23 = arith.constant dense<0.000000e+00> : vector<16x384xf32>
    %39 = tpu.matmul %38, %37, %cst_23 {dimension_numbers = #tpu.dot_dimension_numbers<[1], [0], [0], [1], [0, 0, 1, 1], [], []>} : vector<16x16xf32>, vector<16x384xf32>, vector<16x384xf32> -> vector<16x384xf32>
    %c0_24 = arith.constant 0 : index
    %c0_25 = arith.constant 0 : index
    %40 = vector.load %arg8[%c0_24, %c0_25] : memref<16x1xf32, #tpu.memory_space<vmem>>, vector<16x1xf32>
    %41 = vector.broadcast %40 : vector<16x1xf32> to vector<16x384xf32>
    %42 = arith.addf %39, %41 : vector<16x384xf32>
    %cst_26 = arith.constant 0.000000e+00 : f32
    %43 = vector.broadcast %cst_26 : f32 to vector<16x384xf32>
    %44 = arith.maximumf %42, %43 : vector<16x384xf32>
    %c0_27 = arith.constant 0 : index
    %c0_28 = arith.constant 0 : index
    %45 = vector.load %arg9[%c0_27, %c0_28] : memref<128x16xf32, #tpu.memory_space<vmem>>, vector<128x16xf32>
    %cst_29 = arith.constant dense<0.000000e+00> : vector<128x384xf32>
    %46 = tpu.matmul %45, %44, %cst_29 {dimension_numbers = #tpu.dot_dimension_numbers<[1], [0], [0], [1], [0, 0, 1, 1], [], []>} : vector<128x16xf32>, vector<16x384xf32>, vector<128x384xf32> -> vector<128x384xf32>
    %c0_30 = arith.constant 0 : index
    %c0_31 = arith.constant 0 : index
    %47 = vector.load %arg10[%c0_30, %c0_31] : memref<128x1xf32, #tpu.memory_space<vmem>>, vector<128x1xf32>
    %48 = vector.broadcast %47 : vector<128x1xf32> to vector<128x384xf32>
    %49 = arith.addf %46, %48 : vector<128x384xf32>
    %cst_32 = arith.constant 0.000000e+00 : f32
    %50 = vector.broadcast %cst_32 : f32 to vector<128x384xf32>
    %51 = arith.maximumf %49, %50 : vector<128x384xf32>
    %c0_33 = arith.constant 0 : index
    %c0_34 = arith.constant 0 : index
    %c0_35 = arith.constant 0 : index
    %52 = vector.load %arg1[%c0_33, %c0_34, %c0_35] : memref<3x9x128xf32, #tpu.memory_space<vmem>>, vector<1x8x128xf32>
    %53 = vector.shape_cast %52 : vector<1x8x128xf32> to vector<8x128xf32>
    %54 = vector.extract_strided_slice %51 {offsets = [0, 0], sizes = [128, 128], strides = [1, 1]} : vector<128x384xf32> to vector<128x128xf32>
    %55 = tpu.concatenate %53, %53, %53, %53, %53, %53, %53, %53, %53, %53, %53, %53, %53, %53, %53, %53 in 0 : vector<8x128xf32>, vector<8x128xf32>, vector<8x128xf32>, vector<8x128xf32>, vector<8x128xf32>, vector<8x128xf32>, vector<8x128xf32>, vector<8x128xf32>, vector<8x128xf32>, vector<8x128xf32>, vector<8x128xf32>, vector<8x128xf32>, vector<8x128xf32>, vector<8x128xf32>, vector<8x128xf32>, vector<8x128xf32> -> vector<128x128xf32>
    %56 = arith.mulf %54, %55 : vector<128x128xf32>
    %c1_36 = arith.constant 1 : index
    %c0_37 = arith.constant 0 : index
    %c0_38 = arith.constant 0 : index
    %57 = vector.load %arg1[%c1_36, %c0_37, %c0_38] : memref<3x9x128xf32, #tpu.memory_space<vmem>>, vector<1x8x128xf32>
    %58 = vector.shape_cast %57 : vector<1x8x128xf32> to vector<8x128xf32>
    %59 = vector.extract_strided_slice %51 {offsets = [0, 128], sizes = [128, 128], strides = [1, 1]} : vector<128x384xf32> to vector<128x128xf32>
    %60 = tpu.concatenate %58, %58, %58, %58, %58, %58, %58, %58, %58, %58, %58, %58, %58, %58, %58, %58 in 0 : vector<8x128xf32>, vector<8x128xf32>, vector<8x128xf32>, vector<8x128xf32>, vector<8x128xf32>, vector<8x128xf32>, vector<8x128xf32>, vector<8x128xf32>, vector<8x128xf32>, vector<8x128xf32>, vector<8x128xf32>, vector<8x128xf32>, vector<8x128xf32>, vector<8x128xf32>, vector<8x128xf32>, vector<8x128xf32> -> vector<128x128xf32>
    %61 = arith.mulf %59, %60 : vector<128x128xf32>
    %62 = arith.addf %56, %61 : vector<128x128xf32>
    %63 = arith.addf %53, %58 : vector<8x128xf32>
    %c2_39 = arith.constant 2 : index
    %c0_40 = arith.constant 0 : index
    %c0_41 = arith.constant 0 : index
    %64 = vector.load %arg1[%c2_39, %c0_40, %c0_41] : memref<3x9x128xf32, #tpu.memory_space<vmem>>, vector<1x8x128xf32>
    %65 = vector.shape_cast %64 : vector<1x8x128xf32> to vector<8x128xf32>
    %66 = vector.extract_strided_slice %51 {offsets = [0, 256], sizes = [128, 128], strides = [1, 1]} : vector<128x384xf32> to vector<128x128xf32>
    %67 = tpu.concatenate %65, %65, %65, %65, %65, %65, %65, %65, %65, %65, %65, %65, %65, %65, %65, %65 in 0 : vector<8x128xf32>, vector<8x128xf32>, vector<8x128xf32>, vector<8x128xf32>, vector<8x128xf32>, vector<8x128xf32>, vector<8x128xf32>, vector<8x128xf32>, vector<8x128xf32>, vector<8x128xf32>, vector<8x128xf32>, vector<8x128xf32>, vector<8x128xf32>, vector<8x128xf32>, vector<8x128xf32>, vector<8x128xf32> -> vector<128x128xf32>
    %68 = arith.mulf %66, %67 : vector<128x128xf32>
    %69 = arith.addf %62, %68 : vector<128x128xf32>
    %70 = arith.addf %63, %65 : vector<8x128xf32>
    %c0_42 = arith.constant 0 : index
    %c0_43 = arith.constant 0 : index
    %71 = vector.load %arg11[%c0_42, %c0_43] : memref<8x128xf32, #tpu.memory_space<vmem>>, vector<8x128xf32>
    %cst_44 = arith.constant dense<0.000000e+00> : vector<8x128xf32>
    %72 = tpu.matmul %71, %69, %cst_44 {dimension_numbers = #tpu.dot_dimension_numbers<[1], [0], [0], [1], [0, 0, 1, 1], [], []>} : vector<8x128xf32>, vector<128x128xf32>, vector<8x128xf32> -> vector<8x128xf32>
    %73 = arith.addf %7, %72 : vector<8x128xf32>
    %c0_45 = arith.constant 0 : index
    %c0_46 = arith.constant 0 : index
    %74 = vector.load %arg12[%c0_45, %c0_46] : memref<8x8xf32, #tpu.memory_space<vmem>>, vector<8x8xf32>
    %cst_47 = arith.constant dense<0.000000e+00> : vector<8x128xf32>
    %75 = tpu.matmul %74, %70, %cst_47 {dimension_numbers = #tpu.dot_dimension_numbers<[1], [0], [0], [1], [0, 0, 1, 1], [], []>} : vector<8x8xf32>, vector<8x128xf32>, vector<8x128xf32> -> vector<8x128xf32>
    %76 = arith.addf %73, %75 : vector<8x128xf32>
    %cst_48 = arith.constant 0.000000e+00 : f32
    %77 = vector.broadcast %cst_48 : f32 to vector<8x128xf32>
    %78 = arith.cmpf oge, %76, %77 : vector<8x128xf32>
    %cst_49 = arith.constant 1.000000e-01 : f32
    %79 = vector.broadcast %cst_49 : f32 to vector<8x128xf32>
    %80 = arith.mulf %79, %76 : vector<8x128xf32>
    %81 = arith.select %78, %76, %80 : vector<8x128xi1>, vector<8x128xf32>
    %c0_50 = arith.constant 0 : index
    %c0_51 = arith.constant 0 : index
    %82 = vector.load %arg15[%c0_50, %c0_51] : memref<8x128xf32, #tpu.memory_space<vmem>>, vector<8x128xf32>
    tpu.vector_store %arg15[%c0_50, %c0_51], %81 {strides = array<i32>} : memref<8x128xf32, #tpu.memory_space<vmem>>, vector<8x128xf32>,
    return
  }
  func.func @transform_0(%arg0: i32) -> (i32, i32, i32) {
    %c0_i32 = arith.constant 0 : i32
    %c0_i32_0 = arith.constant 0 : i32
    %c0_i32_1 = arith.constant 0 : i32
    return %c0_i32, %c0_i32_0, %arg0 : i32, i32, i32
  }
  func.func @transform_1(%arg0: i32) -> (i32, i32) {
    %c0_i32 = arith.constant 0 : i32
    %c0_i32_0 = arith.constant 0 : i32
    return %c0_i32, %arg0 : i32, i32
  }
  func.func @transform_2(%arg0: i32) -> (i32, i32) {
    %c0_i32 = arith.constant 0 : i32
    %c0_i32_0 = arith.constant 0 : i32
    %c0_i32_1 = arith.constant 0 : i32
    return %c0_i32, %c0_i32_0 : i32, i32
  }
  func.func @transform_3(%arg0: i32) -> (i32, i32) {
    %c0_i32 = arith.constant 0 : i32
    %c0_i32_0 = arith.constant 0 : i32
    %c0_i32_1 = arith.constant 0 : i32
    return %c0_i32, %c0_i32_0 : i32, i32
  }
  func.func @transform_4(%arg0: i32) -> (i32, i32) {
    %c0_i32 = arith.constant 0 : i32
    %c0_i32_0 = arith.constant 0 : i32
    %c0_i32_1 = arith.constant 0 : i32
    return %c0_i32, %c0_i32_0 : i32, i32
  }
  func.func @transform_5(%arg0: i32) -> (i32, i32) {
    %c0_i32 = arith.constant 0 : i32
    %c0_i32_0 = arith.constant 0 : i32
    %c0_i32_1 = arith.constant 0 : i32
    return %c0_i32, %c0_i32_0 : i32, i32
  }
  func.func @transform_6(%arg0: i32) -> (i32, i32) {
    %c0_i32 = arith.constant 0 : i32
    %c0_i32_0 = arith.constant 0 : i32
    %c0_i32_1 = arith.constant 0 : i32
    return %c0_i32, %c0_i32_0 : i32, i32
  }
  func.func @transform_7(%arg0: i32) -> (i32, i32) {
    %c0_i32 = arith.constant 0 : i32
    %c0_i32_0 = arith.constant 0 : i32
    %c0_i32_1 = arith.constant 0 : i32
    return %c0_i32, %c0_i32_0 : i32, i32
  }
  func.func @transform_8(%arg0: i32) -> (i32, i32) {
    %c0_i32 = arith.constant 0 : i32
    %c0_i32_0 = arith.constant 0 : i32
    %c0_i32_1 = arith.constant 0 : i32
    return %c0_i32, %c0_i32_0 : i32, i32
  }
  func.func @transform_9(%arg0: i32) -> (i32, i32) {
    %c0_i32 = arith.constant 0 : i32
    %c0_i32_0 = arith.constant 0 : i32
    %c0_i32_1 = arith.constant 0 : i32
    return %c0_i32, %c0_i32_0 : i32, i32
  }
  func.func @transform_10(%arg0: i32) -> (i32, i32) {
    %c0_i32 = arith.constant 0 : i32
    %c0_i32_0 = arith.constant 0 : i32
    %c0_i32_1 = arith.constant 0 : i32
    return %c0_i32, %c0_i32_0 : i32, i32
  }
  func.func @transform_11(%arg0: i32) -> (i32, i32) {
    %c0_i32 = arith.constant 0 : i32
    %c0_i32_0 = arith.constant 0 : i32
    %c0_i32_1 = arith.constant 0 : i32
    return %c0_i32, %c0_i32_0 : i32, i32
  }
  func.func @transform_12(%arg0: i32) -> (i32, i32) {
    %c0_i32 = arith.constant 0 : i32
    %c0_i32_0 = arith.constant 0 : i32
    %c0_i32_1 = arith.constant 0 : i32
    return %c0_i32, %c0_i32_0 : i32, i32
  }
  func.func @transform_13(%arg0: i32) -> (i32, i32) {
    %c0_i32 = arith.constant 0 : i32
    %c0_i32_0 = arith.constant 0 : i32
    %c0_i32_1 = arith.constant 0 : i32
    return %c0_i32, %c0_i32_0 : i32, i32
  }
  func.func @transform_14(%arg0: i32) -> (i32, i32) {
    %c0_i32 = arith.constant 0 : i32
    %c0_i32_0 = arith.constant 0 : i32
    return %c0_i32, %arg0 : i32, i32
  }
}

</mosaic_0001>

<bundles_post_ra>
// kernel: ccnn_forward.2
= control target key start
LH: loop header
LB: loop body
LE: loop exit
PB: predicated region body
PF: predicated region fallthrough
CT: control target
= control target key end

     0   :  { %v2620_v0 = vmov 0.0   ;;  %v1819_v1 = vmov 0   ;;  %vm57_vm0 = vcmask 64512   ;;  %vm1820_vm1 = vmmov 0   ;;  %s2605_s2 = inlined_call_operand.vmem [shape: f32[8,1], index: 2, kind: input, shape index: {}]   ;;  %s2606_s1 = inlined_call_operand.vmem [shape: f32[8,128], index: 1, kind: input, shape index: {}]   ;;  %s2607_s12 = inlined_call_operand.vmem [shape: f32[8,8], index: 12, kind: input, shape index: {}]   ;;  %s2608_s3 = inlined_call_operand.vmem [shape: f32[8,1], index: 3, kind: input, shape index: {}]   ;;  %s2609_s7 = inlined_call_operand.vmem [shape: f32[16,1], index: 7, kind: input, shape index: {}]   ;;  %s2610_s9 = inlined_call_operand.vmem [shape: f32[128,1], index: 9, kind: input, shape index: {}]   ;;  %s2611_s13 = inlined_call_operand.vmem [shape: f32[8,1], index: 13, kind: input, shape index: {}]   ;;  %s2612_s4 = inlined_call_operand.vmem [shape: f32[16,8], index: 4, kind: input, shape index: {}]   ;;  %s2613_s0 = inlined_call_operand.vmem [shape: f32[3,9,128], index: 0, kind: input, shape index: {}]   ;;  %s2614_s5 = inlined_call_operand.vmem [shape: f32[16,1], index: 5, kind: input, shape index: {}]   ;;  %s2615_s6 = inlined_call_operand.vmem [shape: f32[16,16], index: 6, kind: input, shape index: {}]   ;;  %s2616_s8 = inlined_call_operand.vmem [shape: f32[128,16], index: 8, kind: input, shape index: {}]   ;;  %s2617_s10 = inlined_call_operand.vmem [shape: f32[8,128], index: 10, kind: input, shape index: {}]   ;;  %s2618_s11 = inlined_call_operand.vmem [shape: f32[8,8], index: 11, kind: input, shape index: {}]   ;;  %s2619_s14 = inlined_call_operand.vmem [shape: f32[8,128], index: 14, kind: output, shape index: {}]  }
   0x1   :  { %1694 = vmatprep.subr.mxu0 %v2620_v0  ;;  %1804 = vset.pattern.permute.xlu0 %v1819_v1  ;;  %v47_v2 = vld [vmem:[%s2605_s2] sm:$0xff]  ;;  %v657_v6 = vld [vmem:[%s2609_s7 + $0x8] sm:$0xff]  ;;  %v864_v7 = vld [vmem:[%s2610_s9 + $0x78] sm:$0xff] }
   0x2   :  { %v50_v3 = vld [vmem:[%s2606_s1] sm:$0xff]  ;;  %1696 = vmatprep.mubr.msk.f32.mxu0 %vm1820_vm1, %v2620_v0  ;;  %138 = vperm.xlu0 %1804, %v47_v2   ;;  %v862_v8 = vld [vmem:[%s2610_s9 + $0x68] sm:$0xff]  ;;  %v860_v9 = vld [vmem:[%s2610_s9 + $0x58] sm:$0xff] }
   0x3   :  { %v49_v4 = vld [vmem:[%s2607_s12] sm:$0xff]  ;;  %1695 = vmatpush3.msra.mxu0 %v50_v3  ;;  %560 = vmatprep.mubr.f32.mxu1 %v2620_v0  ;;  %v858_v10 = vld [vmem:[%s2610_s9 + $0x48] sm:$0xff]  ;;  %v856_v11 = vld [vmem:[%s2610_s9 + $0x38] sm:$0xff] }
   0x4   :  { %v48_v5 = vld [vmem:[%s2608_s3] sm:$0xff]  ;;  %1697 = vmatmul.mubr.msk.f32.vlgmr.msra.gmra.mxu0 %vm57_vm0, %v49_v4  ;;  %1805 = vset.pattern.permute.xlu1 %v1819_v1  ;;  %v854_v12 = vld [vmem:[%s2610_s9 + $0x28] sm:$0xff]  ;;  %v852_v13 = vld [vmem:[%s2610_s9 + $0x18] sm:$0xff]  ;;  %v1821_v1 = vmov 683565275  }
   0x5   :  { %v850_v14 = vld [vmem:[%s2610_s9 + $0x8] sm:$0xff]  ;;  %v51_v15 = vld [vmem:[%s2611_s13] sm:$0xff]  ;;  %v1590_v20 = vld [vmem:[%s2613_s0 + $0x18] ss:$0 sm:$0xff]  ;;  %v1822_v4 = vmov 2475754826  }
   0x6   :  { %144 = vperm.xlu0 %1804, %v48_v5   ;;  %v1952_v16 = vld [vmem:[%s2612_s4] sm:$0xff]  ;;  %v479_v17 = vld [vmem:[%s2614_s5 + $0x8] sm:$0xff]  ;;  %v863_v39 = vld [vmem:[%s2610_s9 + $0x70] sm:$0xff] }
   0x7   :  { %1701 = vmatprep.mubr.msk.f32.mxu0 %vm57_vm0, %v1952_v16  ;;  %v1588_v19 = vld [vmem:[%s2613_s0 + $0x8] ss:$0 sm:$0xff]  ;;  %487 = vperm.xlu1 %1805, %v479_v17   ;;  %v478_v22 = vld [vmem:[%s2614_s5] sm:$0xff]  ;;  %v859_v56 = vld [vmem:[%s2610_s9 + $0x50] sm:$0xff] }
   0x8   :  { %v1592_v21 = vld [vmem:[%s2613_s0 + $0x28] ss:$0 sm:$0xff]  ;;  %v656_v30 = vld [vmem:[%s2609_s7] sm:$0xff] }
   0x9   :  { %v861_v48 = vld [vmem:[%s2610_s9 + $0x60] sm:$0xff] }
   0xa   :  { %665 = vperm.xlu0 %1804, %v657_v6   ;;  %v1823_v6 = vmov 2131351028  }
   0xb   :  { %482 = vperm.xlu1 %1805, %v478_v22  }
   0xe   :  { %942 = vperm.xlu0 %1804, %v864_v7  }
   0xf   :  { %660 = vperm.xlu1 %1805, %v656_v30  }
  0x12   :  { %932 = vperm.xlu0 %1804, %v862_v8   ;;  %v1824_v8 = vmov 2102212464  }
  0x13   :  { %937 = vperm.xlu1 %1805, %v863_v39  }
  0x16   :  { %922 = vperm.xlu0 %1804, %v860_v9  }
  0x17   :  { %927 = vperm.xlu1 %1805, %v861_v48  }
  0x1a   :  { %912 = vperm.xlu0 %1804, %v858_v10  }
  0x1b   :  { %917 = vperm.xlu1 %1805, %v859_v56  }
  0x1e   :  { %902 = vperm.xlu0 %1804, %v856_v11  }
  0x22   :  { %892 = vperm.xlu0 %1804, %v854_v12  }
  0x26   :  { %882 = vperm.xlu0 %1804, %v852_v13   ;;  %v1825_v13 = vmov 920167782  }
  0x2a   :  { %872 = vperm.xlu0 %1804, %v850_v14  }
  0x2e   :  { %54 = vperm.xlu0 %1804, %v51_v15   ;;  %v857_v15 = vld [vmem:[%s2610_s9 + $0x40] sm:$0xff] }
  0x2f   :  { %907 = vperm.xlu1 %1805, %v857_v15  }
  0x7d   :  { %v139_v18 = vpop.permute.xlu0 %138 }
  0x7e   :  { %v141_v23 = vmul.f32 %v1588_v19, %v139_v18  ;;  %v154_v24 = vmul.f32 %v1590_v20, %v139_v18  ;;  %v162_v25 = vmul.f32 %v1592_v21, %v139_v18  ;;  %v1826_v19 = vmov 1326507024  }
  0x81   :  { %v145_v26 = vpop.permute.xlu0 %144 }
  0x82   :  { %v1971_v27 = vadd.f32 %v145_v26, %v141_v23  ;;  %v1973_v28 = vadd.f32 %v154_v24, %v145_v26  ;;  %v1975_v29 = vadd.f32 %v162_v25, %v145_v26 }
  0x84   :  { %v167_v31 = vand.u32 2139095040, %v1971_v27  ;;  %v271_v32 = vand.u32 2139095040, %v1973_v28  ;;  %v375_v33 = vand.u32 2139095040, %v1975_v29  ;;  %v268_v34 = vand.u32 2147483647, %v1973_v28 }
  0x85   :  { %v372_v35 = vand.u32 2147483647, %v1975_v29  ;;  %v164_v55 = vand.u32 2147483647, %v1971_v27 }
  0x86   :  { %v168_v36 = vshrl.u32 %v167_v31, 23  ;;  %v272_v37 = vshrl.u32 %v271_v32, 23  ;;  %v376_v38 = vshrl.u32 %v375_v33, 23  ;;  %v275_v40 = vand.u32 8388607, %v268_v34  ;;  %v855_v33 = vld [vmem:[%s2610_s9 + $0x30] sm:$0xff] }
  0x87   :  { %v379_v41 = vand.u32 8388607, %v372_v35  ;;  %897 = vperm.xlu1 %1805, %v855_v33   ;;  %v849_v33 = vld [vmem:[%s2610_s9] sm:$0xff] }
  0x88   :  { %v1593_v42 = vadd.s32 4294967169, %v168_v36  ;;  %v1597_v43 = vadd.s32 4294967169, %v272_v37  ;;  %v1601_v44 = vadd.s32 4294967169, %v376_v38  ;;  %v276_v49 = vor.u32 8388608, %v275_v40 }
  0x89   :  { %v380_v50 = vor.u32 8388608, %v379_v41 }
  0x8a   :  { %v174_v45 = vadd.s32 1, %v1593_v42  ;;  %v278_v46 = vadd.s32 1, %v1597_v43  ;;  %v382_v47 = vadd.s32 1, %v1601_v44  ;;  %v2003_v59 = vshll.u32 %v276_v49, 8 }
  0x8b   :  { %v2005_v60 = vshll.u32 %v380_v50, 8 }
  0x8c   :  { %vm175_vm2 = vcmp.gt.s32.totalorder %v174_v45, 0  ;;  %vm279_vm3 = vcmp.gt.s32.totalorder %v278_v46, 0  ;;  %vm383_vm4 = vcmp.gt.s32.totalorder %v382_v47, 0 }
  0x8d   :  { %v1995_v51 = vsel %vm175_vm2, %v174_v45, 0  ;;  %v280_v52 = vsel %vm279_vm3, %v278_v46, 0  ;;  %v384_v53 = vsel %vm383_vm4, %v382_v47, 0 }
  0x8e   :  { %v282_v54 = vand.u32 31, %v280_v52  ;;  %v281_v57 = vshrl.u32 %v280_v52, 5  ;;  %v2001_v58 = vand.u32 31, %v384_v53  ;;  %v2008_v61 = vand.u32 31, %v1995_v51 }
  0x8f   :  { %v2010_v63 = vshrl.u32 %v384_v53, 5  ;;  %v853_v53 = vld [vmem:[%s2610_s9 + $0x20] sm:$0xff] }
  0x90   :  { %v283_v62 = vsub.s32 32, %v282_v54  ;;  %v285_v2 = vshll.u32 %v1821_v1, %v282_v54  ;;  %v387_v3 = vsub.s32 32, %v2001_v58  ;;  %v288_v5 = vshll.u32 %v1822_v4, %v282_v54  ;;  %887 = vperm.xlu1 %1805, %v853_v53  }
  0x91   :  { %v291_v7 = vshll.u32 %v1823_v6, %v282_v54  ;;  %v294_v9 = vshll.u32 %v1824_v8, %v282_v54  ;;  %v297_v14 = vshll.u32 %v1825_v13, %v282_v54  ;;  %vm300_vm5 = vcmp.lt.s32.totalorder %v281_v57, 1 }
  0x92   :  { %v286_v10 = vshrl.u32 %v1822_v4, %v283_v62  ;;  %v289_v11 = vshrl.u32 %v1823_v6, %v283_v62  ;;  %v292_v12 = vshrl.u32 %v1824_v8, %v283_v62  ;;  %v284_v17 = vshrl.u32 %v1821_v1, %v283_v62 }
  0x93   :  { %v295_v18 = vshrl.u32 %v1825_v13, %v283_v62  ;;  %v298_v20 = vshrl.u32 %v1826_v19, %v283_v62  ;;  %vm301_vm6 = vcmp.lt.s32.totalorder %v281_v57, 2  ;;  %vm302_vm7 = vcmp.lt.s32.totalorder %v281_v57, 3 }
  0x94   :  { %v287_v21 = vor.u32 %v286_v10, %v285_v2  ;;  %v290_v22 = vor.u32 %v289_v11, %v288_v5  ;;  %v293_v23 = vor.u32 %v292_v12, %v291_v7  ;;  %vm303_vm8 = vcmp.lt.s32.totalorder %v281_v57, 4 }
  0x95   :  { %v296_v24 = vor.u32 %v295_v18, %v294_v9  ;;  %v299_v25 = vor.u32 %v298_v20, %v297_v14  ;;  %v388_v39 = vshrl.u32 %v1821_v1, %v387_v3  ;;  %v389_v42 = vshll.u32 %v1821_v1, %v2001_v58 }
  0x96   :  { %v304_v26 = vsel %vm300_vm5, %v284_v17, %v287_v21  ;;  %v305_v30 = vsel %vm303_vm8, %v293_v23, 2102212464  ;;  %v308_v31 = vsel %vm300_vm5, %v287_v21, %v290_v22  ;;  %v312_v32 = vsel %vm300_vm5, %v290_v22, %v293_v23 }
  0x97   :  { %v306_v36 = vsel %vm302_vm7, %v290_v22, %v305_v30  ;;  %v309_v37 = vsel %vm303_vm8, %v296_v24, 920167782  ;;  %v313_v38 = vsel %vm303_vm8, %v299_v25, 1326507024  ;;  %v390_v43 = vshrl.u32 %v1822_v4, %v387_v3 }
  0x98   :  { %v310_v40 = vsel %vm302_vm7, %v293_v23, %v309_v37  ;;  %v314_v41 = vsel %vm302_vm7, %v296_v24, %v313_v38  ;;  %v307_v44 = vsel %vm301_vm6, %v304_v26, %v306_v36  ;;  %v392_v47 = vshll.u32 %v1822_v4, %v2001_v58 }
  0x99   :  { %v311_v45 = vsel %vm301_vm6, %v308_v31, %v310_v40  ;;  %v315_v46 = vsel %vm301_vm6, %v312_v32, %v314_v41  ;;  %v391_v54 = vor.u32 %v390_v43, %v389_v42  ;;  %v393_v56 = vshrl.u32 %v1823_v6, %v387_v3 }
  0x9a   :  { %v2040_v48 = vmul.u32.u64.low %v2003_v59, %v315_v46  ;;  %v2041_v49 = vmul.u32.u64.high %v2003_v59, %v315_v46, %v2040_v48  ;;  %v2044_v50 = vmul.u32.u64.low %v2003_v59, %v311_v45  ;;  %v2045_v52 = vmul.u32.u64.high %v2003_v59, %v311_v45, %v2044_v50 }
  0x9b   :  { %v395_v57 = vshll.u32 %v1823_v6, %v2001_v58  ;;  %v396_v62 = vshrl.u32 %v1824_v8, %v387_v3  ;;  %v323_v2 = vmul.u32 %v2003_v59, %v307_v44  ;;  %v398_v5 = vshll.u32 %v1824_v8, %v2001_v58 }
  0x9c   :  { %v399_v7 = vshrl.u32 %v1825_v13, %v387_v3  ;;  %v402_v9 = vshrl.u32 %v1826_v19, %v387_v3  ;;  %v394_v10 = vor.u32 %v393_v56, %v392_v47  ;;  %v401_v12 = vshll.u32 %v1825_v13, %v2001_v58  ;;  %v851_v3 = vld [vmem:[%s2610_s9 + $0x10] sm:$0xff] }
  0x9d   :  { %v397_v11 = vor.u32 %v396_v62, %v395_v57  ;;  %vm404_vm9 = vcmp.lt.s32.totalorder %v2010_v63, 1  ;;  %vm325_vm10 = vc.u32 %v2041_v49, %v2044_v50  ;;  %v326_v59 = vadd.s32 1, %v2045_v52  ;;  %877 = vperm.xlu1 %1805, %v851_v3  }
  0x9e   :  { %v400_v14 = vor.u32 %v399_v7, %v398_v5  ;;  %vm405_vm11 = vcmp.lt.s32.totalorder %v2010_v63, 2  ;;  %v403_v15 = vor.u32 %v402_v9, %v401_v12  ;;  %vm406_vm12 = vcmp.lt.s32.totalorder %v2010_v63, 3 }
  0x9f   :  { %vm407_vm13 = vcmp.lt.s32.totalorder %v2010_v63, 4  ;;  %v408_v58 = vsel %vm404_vm9, %v388_v39, %v391_v54  ;;  %v327_v17 = vsel %vm325_vm10, %v326_v59, %v2045_v52  ;;  %v412_v20 = vsel %vm404_vm9, %v391_v54, %v394_v10 }
  0xa0   :  { %v409_v18 = vsel %vm407_vm13, %v397_v11, 2102212464  ;;  %v413_v21 = vsel %vm407_vm13, %v400_v14, 920167782  ;;  %v328_v22 = vadd.s32 %v327_v17, %v323_v2  ;;  %v416_v25 = vsel %vm404_vm9, %v394_v10, %v397_v11 }
  0xa1   :  { %v410_v23 = vsel %vm406_vm12, %v394_v10, %v409_v18  ;;  %v414_v24 = vsel %vm406_vm12, %v397_v11, %v413_v21  ;;  %v179_v26 = vsub.s32 32, %v2008_v61  ;;  %v417_v32 = vsel %vm407_vm13, %v403_v15, 1326507024  ;;  %867 = vperm.xlu1 %1805, %v849_v33  }
  0xa2   :  { %v411_v30 = vsel %vm405_vm11, %v408_v58, %v410_v23  ;;  %v415_v31 = vsel %vm405_vm11, %v412_v20, %v414_v24  ;;  %v329_v36 = vadd.s32 536870912, %v328_v22  ;;  %v418_v37 = vsel %vm406_vm12, %v400_v14, %v417_v32 }
  0xa3   :  { %v2094_v38 = vmul.u32.u64.low %v2005_v60, %v415_v31  ;;  %v2095_v39 = vmul.u32.u64.high %v2005_v60, %v415_v31, %v2094_v38  ;;  %v419_v40 = vsel %vm405_vm11, %v416_v25, %v418_v37  ;;  %v2107_v44 = vshrl.u32 %v1995_v51, 5 }
  0xa4   :  { %v2100_v41 = vshrl.u32 %v329_v36, 30  ;;  %v2103_v42 = vmul.u32.u64.low %v2005_v60, %v419_v40  ;;  %v2104_v43 = vmul.u32.u64.high %v2005_v60, %v419_v40, %v2103_v42  ;;  %v427_v45 = vmul.u32 %v2005_v60, %v411_v30 }
  0xa5   :  { %v171_v46 = vand.u32 8388607, %v164_v55  ;;  %v430_v63 = vadd.s32 1, %v2095_v39  ;;  %v185_v48 = vshrl.u32 %v1823_v6, %v179_v26  ;;  %v188_v52 = vshrl.u32 %v1824_v8, %v179_v26 }
  0xa6   :  { %v331_v47 = vshll.u32 %v2100_v41, 30  ;;  %v181_v53 = vshll.u32 %v1821_v1, %v2008_v61  ;;  %v182_v54 = vshrl.u32 %v1822_v4, %v179_v26  ;;  %v190_v51 = vshll.u32 %v1824_v8, %v2008_v61 }
  0xa7   :  { %v191_v60 = vshrl.u32 %v1825_v13, %v179_v26  ;;  %vm429_vm14 = vc.u32 %v2104_v43, %v2094_v38  ;;  %v184_v57 = vshll.u32 %v1822_v4, %v2008_v61  ;;  %v187_v62 = vshll.u32 %v1823_v6, %v2008_v61 }
  0xa8   :  { %v332_v56 = vsub.s32 %v328_v22, %v331_v47  ;;  %v431_v2 = vsel %vm429_vm14, %v430_v63, %v2095_v39  ;;  %v193_v7 = vshll.u32 %v1825_v13, %v2008_v61  ;;  %v194_v8 = vshrl.u32 %v1826_v19, %v179_v26 }
  0xa9   :  { %v192_v5 = vor.u32 %v191_v60, %v190_v51  ;;  %v432_v10 = vadd.s32 %v431_v2, %v427_v45  ;;  %v186_v11 = vor.u32 %v185_v48, %v184_v57  ;;  %v189_v12 = vor.u32 %v188_v52, %v187_v62 }
  0xaa   :  { %v334_v9 = vsub.s32 0, %v332_v56  ;;  %v183_v59 = vor.u32 %v182_v54, %v181_v53  ;;  %v195_v14 = vor.u32 %v194_v8, %v193_v7  ;;  %v172_v4 = vor.u32 8388608, %v171_v46 }
  0xab   :  { %v433_v15 = vadd.s32 536870912, %v432_v10  ;;  %vm199_vm15 = vcmp.lt.s32.totalorder %v2107_v44, 4  ;;  %vm196_vm2 = vcmp.lt.s32.totalorder %v2107_v44, 1  ;;  %vm198_vm3 = vcmp.lt.s32.totalorder %v2107_v44, 3 }
  0xac   :  { %v1598_v3 = vmin.u32 %v334_v9, %v332_v56  ;;  %v205_v6 = vsel %vm199_vm15, %v192_v5, 920167782  ;;  %v208_v61 = vsel %vm196_vm2, %v186_v11, %v189_v12  ;;  %v204_v19 = vsel %vm196_vm2, %v183_v59, %v186_v11 }
  0xad   :  { %v2139_v13 = vshrl.u32 %v433_v15, 30  ;;  %v206_v17 = vsel %vm198_vm3, %v189_v12, %v205_v6  ;;  %v209_v18 = vsel %vm199_vm15, %v195_v14, 1326507024  ;;  %vm197_vm4 = vcmp.lt.s32.totalorder %v2107_v44, 2 }
  0xae   :  { %v336_v58 = vclz %v1598_v3  ;;  %v210_v21 = vsel %vm198_vm3, %v192_v5, %v209_v18  ;;  %v212_v22 = vshll.u32 %v172_v4, 8  ;;  %v180_v24 = vshrl.u32 %v1821_v1, %v179_v26 }
  0xaf   :  { %v435_v23 = vshll.u32 %v2139_v13, 30  ;;  %v201_v25 = vsel %vm199_vm15, %v189_v12, 2102212464  ;;  %v211_v30 = vsel %vm197_vm4, %v208_v61, %v210_v21  ;;  %v207_v31 = vsel %vm197_vm4, %v204_v19, %v206_v17 }
  0xb0   :  { %v1599_v20 = vadd.s32 4294967294, %v336_v58  ;;  %v2158_v32 = vmul.u32.u64.low %v212_v22, %v211_v30  ;;  %v2159_v33 = vmul.u32.u64.high %v212_v22, %v211_v30, %v2158_v32  ;;  %v324_v39 = vadd.s32 %v2044_v50, %v2041_v49 }
  0xb1   :  { %v436_v37 = vsub.s32 %v432_v10, %v435_v23  ;;  %v200_v26 = vsel %vm196_vm2, %v180_v24, %v183_v59  ;;  %v202_v45 = vsel %vm198_vm3, %v186_v11, %v201_v25  ;;  %v428_v44 = vadd.s32 %v2094_v38, %v2104_v43 }
  0xb2   :  { %vm1600_vm5 = vcmp.lt.s32.totalorder %v1599_v20, 0  ;;  %v2167_v46 = vmul.u32.u64.low %v212_v22, %v207_v31  ;;  %v2168_v47 = vmul.u32.u64.high %v212_v22, %v207_v31, %v2167_v46  ;;  %v203_v49 = vsel %vm197_vm4, %v200_v26, %v202_v45 }
  0xb3   :  { %v339_v36 = vsel %vm1600_vm5, 0, %v1599_v20  ;;  %v438_v42 = vsub.s32 0, %v436_v37  ;;  %v219_v2 = vmul.u32 %v212_v22, %v203_v49  ;;  %vm270_vm8 = vcmp.lt.s32.totalorder %v1973_v28, 0 }
  0xb4   :  { %v340_v40 = vsub.s32 32, %v339_v36  ;;  %v344_v1 = vsub.s32 4294967266, %v339_v36  ;;  %v341_v63 = vshll.u32 %v332_v56, %v339_v36  ;;  %vm221_vm6 = vc.u32 %v2159_v33, %v2167_v46 }
  0xb5   :  { %v1602_v53 = vmin.u32 %v438_v42, %v436_v37  ;;  %v222_v57 = vadd.s32 1, %v2168_v47  ;;  %v354_v3 = vsub.s32 4, %v2100_v41  ;;  %vm2185_vm9 = vcmp.le.f32.partialorder %v268_v34, 0.7853982 }
  0xb6   :  { %v342_v48 = vshrl.u32 %v324_v39, %v340_v40  ;;  %v345_v52 = vadd.s32 127, %v344_v1  ;;  %v458_v40 = vsub.s32 4, %v2139_v13  ;;  %vm374_vm10 = vcmp.lt.s32.totalorder %v1975_v29, 0 }
  0xb7   :  { %v440_v50 = vclz %v1602_v53  ;;  %v223_v56 = vsel %vm221_vm6, %v222_v57, %v2168_v47  ;;  %v355_v21 = vsel %vm270_vm8, %v354_v3, %v2100_v41  ;;  %vm2202_vm11 = vcmp.le.f32.partialorder %v372_v35, 0.7853982 }
  0xb8   :  { %v343_v54 = vor.u32 %v342_v48, %v341_v63  ;;  %v346_v51 = vshll.u32 %v345_v52, 23  ;;  %v224_v8 = vadd.s32 %v223_v56, %v219_v2  ;;  %v357_v24 = vsel %vm2185_vm9, 0, %v355_v21 }
  0xb9   :  { %v1603_v62 = vadd.s32 4294967294, %v440_v50  ;;  %v459_v63 = vsel %vm374_vm10, %v458_v40, %v2139_v13  ;;  %v220_v35 = vadd.s32 %v2167_v46, %v2159_v33  ;;  %vm360_vm2 = vweird.f32 %v1973_v28 }
  0xba   :  { %v347_v60 = vor.u32 4788187, %v346_v51  ;;  %v350_v7 = vcvt.s32.f32 %v343_v54  ;;  %v225_v59 = vadd.s32 536870912, %v224_v8  ;;  %v461_v50 = vsel %vm2202_vm11, 0, %v459_v63 }
  0xbb   :  { %vm1604_vm7 = vcmp.lt.s32.totalorder %v1603_v62, 0  ;;  %v465_v46 = vadd.s32 3, %v461_v50  ;;  %vm166_vm4 = vcmp.lt.s32.totalorder %v1971_v27, 0  ;;  %vm2219_vm6 = vcmp.le.f32.partialorder %v164_v55, 0.7853982  ;;  %v477_v55 = vld [vmem:[%s2612_s4 + $0x8] sm:$0xff] }
  0xbc   :  { %v348_v5 = vand.u32 2147483647, %v347_v60  ;;  %v443_v10 = vsel %vm1604_vm7, 0, %v1603_v62  ;;  %v2181_v58 = vshrl.u32 %v225_v59, 30 }
  0xbd   :  { %v444_v11 = vsub.s32 32, %v443_v10  ;;  %v448_v12 = vsub.s32 4294967266, %v443_v10  ;;  %v445_v15 = vshll.u32 %v436_v37, %v443_v10  ;;  %v361_v37 = vadd.s32 3, %v357_v24 }
  0xbe   :  { %v351_v9 = vmul.f32 %v350_v7, %v348_v5  ;;  %v227_v20 = vshll.u32 %v2181_v58, 30 }
  0xbf   :  { %v446_v4 = vshrl.u32 %v428_v44, %v444_v11  ;;  %v449_v6 = vadd.s32 127, %v448_v12  ;;  %v362_v45 = vand.u32 3, %v361_v37  ;;  %v466_v11 = vand.u32 3, %v465_v46  ;;  %v654_v37 = vld [vmem:[%s2615_s6] sm:$0xff] }
  0xc0   :  { %v352_v14 = vxor.u32 2147483648, %v351_v9  ;;  %v228_v34 = vsub.s32 %v224_v8, %v227_v20 }
  0xc1   :  { %v447_v17 = vor.u32 %v446_v4, %v445_v15  ;;  %v450_v18 = vshll.u32 %v449_v6, 23  ;;  %vm367_vm13 = vcmp.eq.s32.totalorder %v362_v45, 2  ;;  %vm364_vm14 = vcmp.eq.s32.totalorder %v362_v45, 0 }
  0xc2   :  { %v353_v38 = vsel %vm270_vm8, %v352_v14, %v351_v9  ;;  %v230_v31 = vsub.s32 0, %v228_v34  ;;  %vm363_vm15 = vcmp.lt.s32.totalorder %v362_v45, 2  ;;  %vm471_vm3 = vcmp.eq.s32.totalorder %v466_v11, 2 }
  0xc3   :  { %v356_v19 = vsel %vm2185_vm9, %v1973_v28, %v353_v38  ;;  %v451_v22 = vor.u32 4788187, %v450_v18  ;;  %v454_v30 = vcvt.s32.f32 %v447_v17  ;;  %v250_v6 = vsub.s32 4, %v2181_v58 }
  0xc4   :  { %v2189_v43 = vpop.f32.mrf.mxu0  ;;  %1806 = vcosq.f32 %v356_v19  ;;  %v1594_v36 = vmin.u32 %v230_v31, %v228_v34  ;;  %vm468_vm5 = vcmp.eq.s32.totalorder %v466_v11, 0  ;;  %vm467_vm7 = vcmp.lt.s32.totalorder %v466_v11, 2 }
  0xc5   :  { %2624 = vst [vmem:[#allocation2_spill] sm:$0xff] %v2189_v43  ;;  %1808 = vsinq.f32 %v356_v19  ;;  %v452_v25 = vand.u32 2147483647, %v451_v22  ;;  %vm464_vm8 = vweird.f32 %v1975_v29  ;;  %v251_v21 = vsel %vm166_vm4, %v250_v6, %v2181_v58  ;;  %v835_v6 = vld [vmem:[%s2616_s8 + $0x10] sm:$0xff] }
  0xc6   :  { %v1698_v23 = vpop.f32.mrf.mxu0  ;;  %v232_v1 = vclz %v1594_v36  ;;  %v253_v22 = vsel %vm2219_vm6, 0, %v251_v21  ;;  %v840_v21 = vld [vmem:[%s2616_s8 + $0x38] sm:$0xff] }
  0xc7   :  { %v455_v32 = vmul.f32 %v454_v30, %v452_v25 }
  0xc8   :  { %v1595_v42 = vadd.s32 4294967294, %v232_v1 }
  0xc9   :  { %v456_v39 = vxor.u32 2147483648, %v455_v32 }
  0xca   :  { %vm1596_vm12 = vcmp.lt.s32.totalorder %v1595_v42, 0 }
  0xcb   :  { %v457_v26 = vsel %vm374_vm10, %v456_v39, %v455_v32  ;;  %v235_v48 = vsel %vm1596_vm12, 0, %v1595_v42  ;;  %vm256_vm12 = vweird.f32 %v1971_v27  ;;  %v488_v39 = vpop.permute.xlu1 %487 }
  0xcc   :  { %v460_v47 = vsel %vm2202_vm11, %v1975_v29, %v457_v26  ;;  %v236_v53 = vsub.s32 32, %v235_v48  ;;  %v240_v54 = vsub.s32 4294967266, %v235_v48  ;;  %v237_v57 = vshll.u32 %v228_v34, %v235_v48 }
  0xcd   :  { %1810 = vcosq.f32 %v460_v47  ;;  %v257_v29 = vadd.s32 3, %v253_v22  ;;  %v842_v22 = vld [vmem:[%s2616_s8 + $0x48] sm:$0xff] }
  0xce   :  { %1812 = vsinq.f32 %v460_v47  ;;  %v238_v62 = vshrl.u32 %v220_v35, %v236_v53  ;;  %v241_v13 = vadd.s32 127, %v240_v54 }
  0xcf   :  { %v258_v34 = vand.u32 3, %v257_v29  ;;  %v483_v1 = vpop.permute.xlu1 %482  ;;  %v843_v29 = vld [vmem:[%s2616_s8 + $0x50] sm:$0xff] }
  0xd0   :  { %v239_v7 = vor.u32 %v238_v62, %v237_v57  ;;  %v242_v56 = vshll.u32 %v241_v13, 23 }
  0xd1   :  { %v1807_v52 = vpop.eup %1806  ;;  %vm263_vm9 = vcmp.eq.s32.totalorder %v258_v34, 2  ;;  %vm260_vm10 = vcmp.eq.s32.totalorder %v258_v34, 0  ;;  %vm259_vm11 = vcmp.lt.s32.totalorder %v258_v34, 2  ;;  %v844_v34 = vld [vmem:[%s2616_s8 + $0x58] sm:$0xff] }
  0xd2   :  { %v1809_v51 = vpop.eup %1808  ;;  %v368_v49 = vxor.u32 2147483648, %v1807_v52  ;;  %v243_v9 = vor.u32 4788187, %v242_v56  ;;  %v246_v44 = vcvt.s32.f32 %v239_v7 }
  0xd3   :  { %v365_v60 = vxor.u32 2147483648, %v1809_v51  ;;  %v661_v56 = vpop.permute.xlu1 %660 }
  0xd4   :  { %v369_v2 = vsel %vm367_vm13, %v368_v49, %v1809_v51  ;;  %v244_v10 = vand.u32 2147483647, %v243_v9  ;;  %vm668_vm13 = vcmask 130048  }
  0xd5   :  { %v366_v5 = vsel %vm364_vm14, %v1807_v52, %v365_v60 }
  0xd6   :  { %v370_v33 = vsel %vm363_vm15, %v366_v5, %v369_v2  ;;  %v247_v12 = vmul.f32 %v246_v44, %v244_v10  ;;  %v666_v5 = vpop.permute.xlu0 %665 }
  0xd7   :  { %v371_v8 = vsel %vm360_vm2, nan, %v370_v33 }
  0xd8   :  { %526 = vmatprep.subr.mxu1 %v371_v8  ;;  %v248_v15 = vxor.u32 2147483648, %v247_v12 }
  0xda   :  { %v1811_v59 = vpop.eup %1810  ;;  %v249_v38 = vsel %vm166_vm4, %v248_v15, %v247_v12 }
  0xdb   :  { %v1813_v14 = vpop.eup %1812  ;;  %v472_v3 = vxor.u32 2147483648, %v1811_v59  ;;  %v252_v17 = vsel %vm2219_vm6, %v1971_v27, %v249_v38  ;;  %v836_v38 = vld [vmem:[%s2616_s8 + $0x18] sm:$0xff] }
  0xdc   :  { %v469_v4 = vxor.u32 2147483648, %v1813_v14  ;;  %1814 = vcosq.f32 %v252_v17 }
  0xdd   :  { %v473_v28 = vsel %vm471_vm3, %v472_v3, %v1813_v14  ;;  %1816 = vsinq.f32 %v252_v17  ;;  %v837_v17 = vld [vmem:[%s2616_s8 + $0x20] sm:$0xff] }
  0xde   :  { %v470_v19 = vsel %vm468_vm5, %v1811_v59, %v469_v4  ;;  %v833_v4 = vld [vmem:[%s2616_s8] sm:$0xff] }
  0xdf   :  { %v474_v18 = vsel %vm467_vm7, %v470_v19, %v473_v28  ;;  %v834_v19 = vld [vmem:[%s2616_s8 + $0x8] sm:$0xff] }
  0xe0   :  { %v475_v20 = vsel %vm464_vm8, nan, %v474_v18  ;;  %v838_v18 = vld [vmem:[%s2616_s8 + $0x28] sm:$0xff] }
  0xe1   :  { %1699 = vmatprep.subr.mxu0 %v475_v20 }
  0xe2   :  { %1700 = vmatpush3.msra.mxu0 %v475_v20  ;;  %v839_v20 = vld [vmem:[%s2616_s8 + $0x30] sm:$0xff] }
  0xe3   :  { %1702 = vmatmul.mubr.msk.f32.vlgmr.msra.gmra.mxu0 %vm57_vm0, %v477_v55 }
  0xe4   :  { %739 = vmatprep.mubr.f32.mxu0 %v2620_v0 }
  0xe9   :  { %v1815_v23 = vpop.eup %1814 }
  0xea   :  { %v1817_v24 = vpop.eup %1816  ;;  %v264_v25 = vxor.u32 2147483648, %v1815_v23 }
  0xeb   :  { %v261_v58 = vxor.u32 2147483648, %v1817_v24 }
  0xec   :  { %v265_v30 = vsel %vm263_vm9, %v264_v25, %v1817_v24  ;;  %v846_v24 = vld [vmem:[%s2616_s8 + $0x68] sm:$0xff]  ;;  %v847_v25 = vld [vmem:[%s2616_s8 + $0x70] sm:$0xff] }
  0xed   :  { %v262_v31 = vsel %vm260_vm10, %v1815_v23, %v261_v58  ;;  %v845_v23 = vld [vmem:[%s2616_s8 + $0x60] sm:$0xff]  ;;  %v848_v58 = vld [vmem:[%s2616_s8 + $0x78] sm:$0xff] }
  0xee   :  { %v266_v32 = vsel %vm259_vm11, %v262_v31, %v265_v30  ;;  %v2350_v30 = vpop.permute.xlu1 %937  ;;  %v2352_v31 = vpop.permute.xlu0 %942 }
  0xef   :  { %v267_v36 = vsel %vm256_vm12, nan, %v266_v32 }
  0xf0   :  { %527 = vmatpush1.msra.mxu1 %v267_v36 }
  0xf1   :  { %1605 = vmatmul.mubr.msk.f32.vlgmr.msra.gmra.mxu1 %vm57_vm0, %v1952_v16  ;;  %v655_v16 = vld [vmem:[%s2615_s6 + $0x8] sm:$0xff] }
  0xf2   :  { %566 = vmatprep.mubr.f32.mxu1 %v2620_v0  ;;  %v2354_v32 = vpop.permute.xlu1 %927  ;;  %v2356_v36 = vpop.permute.xlu0 %932 }
  0xf5   :  { %1606 = vmatmul.mubr.msk.f32.gmra.mxu1 %vm57_vm0, %v477_v55  ;;  %v841_v55 = vld [vmem:[%s2616_s8 + $0x40] sm:$0xff] }
  0xf6   :  { %1708 = vmatprep.mubr.msk.f32.mxu1 %vm668_vm13, %v654_v37 }
 0x1a3   :  { %v1703_v40 = vpop.f32.mrf.mxu0 }
 0x1a4   :  { %v645_v27 = vadd.f32 %v1703_v40, %v488_v39 }
 0x1a5   :  { %v639_v41 = vpop.f32.mrf.mxu0 }
 0x1a6   :  { %v653_v26 = vmax.f32 %v645_v27, 0.0  ;;  %v640_v42 = vadd.f32 %v639_v41, %v483_v1 }
 0x1a8   :  { %v650_v45 = vmax.f32 %v640_v42, 0.0  ;;  %1704 = vmatprep.subr.mxu1 %v653_v26 }
 0x1a9   :  { %1705 = vmatpush3.msra.mxu1 %v653_v26 }
 0x1aa   :  { %1706 = vmatprep.subr.mxu1 %v650_v45 }
 0x1ab   :  { %1707 = vmatpush3.msra.mxu1 %v650_v45 }
 0x1ac   :  { %1709 = vmatmul.mubr.msk.f32.vlgmr.msra.gmra.mxu1 %vm668_vm13, %v655_v16 }
 0x1ad   :  { %1069 = vmatprep.mubr.f32.mxu1 %v2620_v0 }
 0x1b1   :  { %v562_v47 = vpop.f32.mrf.mxu1 }
 0x1b2   :  { %v563_v51 = vadd.f32 %v562_v47, %v483_v1 }
 0x1b3   :  { %v564_v63 = vpop.f32.mrf.mxu1 }
 0x1b4   :  { %v565_v53 = vadd.f32 %v564_v63, %v483_v1  ;;  %v648_v57 = vmax.f32 %v563_v51, 0.0  ;;  %v2390_v51 = vld [vmem:[%s2613_s0 + $0x10] sm:$0xff] }
 0x1b5   :  { %v568_v48 = vpop.f32.mrf.mxu1 }
 0x1b6   :  { %v569_v52 = vadd.f32 %v568_v48, %v488_v39  ;;  %v649_v60 = vmax.f32 %v565_v53, 0.0 }
 0x1b7   :  { %v570_v35 = vpop.f32.mrf.mxu1 }
 0x1b8   :  { %v571_v54 = vadd.f32 %v570_v35, %v488_v39  ;;  %v651_v50 = vmax.f32 %v569_v52, 0.0  ;;  %v2360_v39 = vpop.permute.xlu0 %922 }
 0x1ba   :  { %v652_v49 = vmax.f32 %v571_v54, 0.0  ;;  %v2385_v54 = vld [vmem:[%s2613_s0] sm:$0xff] }
 0x1bc   :  { %703 = vmatprep.subr.mxu0 %v652_v49  ;;  %v2364_v27 = vpop.permute.xlu0 %912 }
 0x1bd   :  { %704 = vmatpush1.msra.mxu0 %v651_v50 }
 0x1be   :  { %705 = vmatprep.subr.mxu0 %v649_v60 }
 0x1bf   :  { %706 = vmatpush1.msra.mxu0 %v648_v57 }
 0x1c0   :  { %1609 = vmatmul.mubr.msk.f32.vlgmr.msra.gmra.mxu0 %vm668_vm13, %v654_v37  ;;  %v2358_v37 = vpop.permute.xlu1 %917  ;;  %v2368_v41 = vpop.permute.xlu0 %902 }
 0x1c1   :  { %745 = vmatprep.mubr.f32.mxu0 %v2620_v0 }
 0x1c4   :  { %1610 = vmatmul.mubr.msk.f32.gmra.mxu0 %vm668_vm13, %v655_v16  ;;  %v2362_v40 = vpop.permute.xlu1 %907  ;;  %v2372_v42 = vpop.permute.xlu0 %892 }
 0x1c5   :  { %1057 = vmatprep.mubr.f32.mxu0 %v2620_v0 }
 0x1c8   :  { %v2366_v1 = vpop.permute.xlu1 %897  ;;  %v2392_v50 = vpop.permute.xlu0 %882 }
 0x1cc   :  { %v2370_v26 = vpop.permute.xlu1 %887 }
 0x1d0   :  { %v2374_v45 = vpop.permute.xlu1 %877 }
 0x26c   :  { %v1710_v7 = vpop.f32.mrf.mxu1 }
 0x26d   :  { %v824_v12 = vadd.f32 %v1710_v7, %v666_v5 }
 0x26e   :  { %v818_v44 = vpop.f32.mrf.mxu1 }
 0x26f   :  { %v819_v3 = vadd.f32 %v818_v44, %v661_v56  ;;  %v832_v28 = vmax.f32 %v824_v12, 0.0 }
 0x271   :  { %v829_v61 = vmax.f32 %v819_v3, 0.0 }
 0x280   :  { %v741_v62 = vpop.f32.mrf.mxu0 }
 0x281   :  { %v742_v10 = vadd.f32 %v741_v62, %v661_v56 }
 0x282   :  { %v743_v13 = vpop.f32.mrf.mxu0 }
 0x283   :  { %v744_v8 = vadd.f32 %v743_v13, %v661_v56  ;;  %v827_v15 = vmax.f32 %v742_v10, 0.0 }
 0x284   :  { %v747_v2 = vpop.f32.mrf.mxu0 }
 0x285   :  { %v748_v33 = vadd.f32 %v747_v2, %v666_v5  ;;  %v828_v14 = vmax.f32 %v744_v8, 0.0 }
 0x286   :  { %v749_v46 = vpop.f32.mrf.mxu0 }
 0x287   :  { %v750_v9 = vadd.f32 %v749_v46, %v666_v5  ;;  %v830_v59 = vmax.f32 %v748_v33, 0.0 }
 0x289   :  { %v831_v11 = vmax.f32 %v750_v9, 0.0 }
 0x28b   :  { %1021 = vmatprep.subr.mxu0 %v831_v11  ;;  %1779 = vmatprep.subr.mxu1 %v831_v11 }
 0x28c   :  { %1022 = vmatpush1.msra.mxu0 %v830_v59  ;;  %1781 = vmatpush1.msra.mxu1 %v830_v59 }
 0x28d   :  { %1023 = vmatprep.subr.mxu0 %v828_v14  ;;  %1780 = vmatprep.subr.mxu1 %v828_v14 }
 0x28e   :  { %1024 = vmatpush1.msra.mxu0 %v827_v15  ;;  %1782 = vmatpush1.msra.mxu1 %v827_v15 }
 0x28f   :  { %1613 = vmatmul.mubr.msk.f32.vlgmr.msra.gmra.mxu0 %vm668_vm13, %v833_v4  ;;  %1615 = vmatmul.mubr.msk.f32.vlgmr.msra.gmra.mxu1 %vm668_vm13, %v835_v6 }
 0x290   :  { %1711 = vmatprep.subr.mxu0 %v832_v28  ;;  %1063 = vmatprep.mubr.f32.mxu0 %v2620_v0 }
 0x291   :  { %1712 = vmatpush3.msra.mxu0 %v832_v28  ;;  %1075 = vmatprep.mubr.f32.mxu1 %v2620_v0 }
 0x292   :  { %1713 = vmatprep.subr.mxu0 %v829_v61 }
 0x293   :  { %1714 = vmatpush3.msra.mxu0 %v829_v61  ;;  %1616 = vmatmul.mubr.msk.f32.gmra.mxu1 %vm668_vm13, %v836_v38 }
 0x294   :  { %1614 = vmatmul.mubr.msk.f32.gmra.mxu0 %vm668_vm13, %v834_v19  ;;  %1081 = vmatprep.mubr.f32.mxu1 %v2620_v0 }
 0x295   :  { %1715 = vmatprep.mubr.msk.f32.mxu0 %vm668_vm13, %v833_v4  ;;  %1739 = vmatprep.subr.mxu0 %v2620_v0 }
 0x297   :  { %1617 = vmatmul.mubr.msk.f32.gmra.mxu1 %vm668_vm13, %v837_v17 }
 0x298   :  { %1716 = vmatmul.mubr.msk.f32.vlgmr.msra.gmra.mxu0 %vm668_vm13, %v834_v19  ;;  %1087 = vmatprep.mubr.f32.mxu1 %v2620_v0 }
 0x299   :  { %1718 = vmatprep.mubr.msk.f32.mxu0 %vm668_vm13, %v835_v6 }
 0x29b   :  { %1618 = vmatmul.mubr.msk.f32.gmra.mxu1 %vm668_vm13, %v838_v18 }
 0x29c   :  { %1719 = vmatmul.mubr.msk.f32.gmra.mxu0 %vm668_vm13, %v836_v38  ;;  %1093 = vmatprep.mubr.f32.mxu1 %v2620_v0 }
 0x29d   :  { %1721 = vmatprep.mubr.msk.f32.mxu0 %vm668_vm13, %v837_v17 }
 0x29f   :  { %1619 = vmatmul.mubr.msk.f32.gmra.mxu1 %vm668_vm13, %v839_v20 }
 0x2a0   :  { %1722 = vmatmul.mubr.msk.f32.gmra.mxu0 %vm668_vm13, %v838_v18  ;;  %1099 = vmatprep.mubr.f32.mxu1 %v2620_v0 }
 0x2a1   :  { %1724 = vmatprep.mubr.msk.f32.mxu0 %vm668_vm13, %v839_v20 }
 0x2a3   :  { %1620 = vmatmul.mubr.msk.f32.gmra.mxu1 %vm668_vm13, %v840_v21 }
 0x2a4   :  { %1725 = vmatmul.mubr.msk.f32.gmra.mxu0 %vm668_vm13, %v840_v21  ;;  %1105 = vmatprep.mubr.f32.mxu1 %v2620_v0 }
 0x2a5   :  { %1727 = vmatprep.mubr.msk.f32.mxu0 %vm668_vm13, %v841_v55 }
 0x2a7   :  { %1621 = vmatmul.mubr.msk.f32.gmra.mxu1 %vm668_vm13, %v841_v55 }
 0x2a8   :  { %1728 = vmatmul.mubr.msk.f32.gmra.mxu0 %vm668_vm13, %v842_v22  ;;  %1111 = vmatprep.mubr.f32.mxu1 %v2620_v0 }
 0x2a9   :  { %1730 = vmatprep.mubr.msk.f32.mxu0 %vm668_vm13, %v843_v29 }
 0x2ab   :  { %1622 = vmatmul.mubr.msk.f32.gmra.mxu1 %vm668_vm13, %v842_v22 }
 0x2ac   :  { %1731 = vmatmul.mubr.msk.f32.gmra.mxu0 %vm668_vm13, %v844_v34  ;;  %1117 = vmatprep.mubr.f32.mxu1 %v2620_v0 }
 0x2ad   :  { %1733 = vmatprep.mubr.msk.f32.mxu0 %vm668_vm13, %v845_v23 }
 0x2af   :  { %1623 = vmatmul.mubr.msk.f32.gmra.mxu1 %vm668_vm13, %v843_v29 }
 0x2b0   :  { %1734 = vmatmul.mubr.msk.f32.gmra.mxu0 %vm668_vm13, %v846_v24  ;;  %1123 = vmatprep.mubr.f32.mxu1 %v2620_v0 }
 0x2b1   :  { %1736 = vmatprep.mubr.msk.f32.mxu0 %vm668_vm13, %v847_v25 }
 0x2b3   :  { %1624 = vmatmul.mubr.msk.f32.gmra.mxu1 %vm668_vm13, %v844_v34 }
 0x2b4   :  { %1737 = vmatmul.mubr.msk.f32.gmra.mxu0 %vm668_vm13, %v848_v58  ;;  %1129 = vmatprep.mubr.f32.mxu1 %v2620_v0 }
 0x2b5   :  { %1771 = vmatprep.mubr.msk.f32.mxu0 %vm1820_vm1, %v2620_v0 }
 0x2b7   :  { %1625 = vmatmul.mubr.msk.f32.gmra.mxu1 %vm668_vm13, %v845_v23 }
 0x2b8   :  { %1135 = vmatprep.mubr.f32.mxu1 %v2620_v0 }
 0x2bb   :  { %1626 = vmatmul.mubr.msk.f32.gmra.mxu1 %vm668_vm13, %v846_v24 }
 0x2bc   :  { %1141 = vmatprep.mubr.f32.mxu1 %v2620_v0 }
 0x2bf   :  { %1627 = vmatmul.mubr.msk.f32.gmra.mxu1 %vm668_vm13, %v847_v25 }
 0x2c0   :  { %1147 = vmatprep.mubr.f32.mxu1 %v2620_v0 }
 0x2c3   :  { %1628 = vmatmul.mubr.msk.f32.gmra.mxu1 %vm668_vm13, %v848_v58 }
 0x34f   :  { %v2376_v16 = vpop.f32.mrf.mxu0  ;;  %v1071_v47 = vpop.f32.mrf.mxu1 }
 0x350   :  { %2629 = vst [vmem:[#allocation3_spill] sm:$0xff] %v2376_v16  ;;  %v1072_v63 = vadd.f32 %v1071_v47, %v2374_v45 }
 0x351   :  { %v2379_v48 = vpop.f32.mrf.mxu0  ;;  %v1073_v52 = vpop.f32.mrf.mxu1 }
 0x352   :  { %2630 = vst [vmem:[#allocation4_spill] sm:$0xff] %v2379_v48  ;;  %v1305_v35 = vmax.f32 %v1072_v63, 0.0  ;;  %v1074_v53 = vadd.f32 %v1073_v52, %v2374_v45 }
 0x353   :  { %v1077_v49 = vpop.f32.mrf.mxu1 }
 0x354   :  { %v1306_v60 = vmax.f32 %v1074_v53, 0.0  ;;  %v2394_v57 = vpop.f32.mrf.mxu0  ;;  %v1078_v62 = vadd.f32 %v1077_v49, %v2392_v50  ;;  %v1350_v2 = vmul.f32 %v2385_v54, %v1305_v35 }
 0x355   :  { %v1079_v13 = vpop.f32.mrf.mxu1 }
 0x356   :  { %v1367_v5 = vmul.f32 %v2390_v51, %v1306_v60  ;;  %v2399_v7 = vpop.f32.mrf.mxu0  ;;  %v1080_v56 = vadd.f32 %v1079_v13, %v2392_v50  ;;  %v1308_v33 = vmax.f32 %v1078_v62, 0.0 }
 0x357   :  { %v1083_v46 = vpop.f32.mrf.mxu1 }
 0x358   :  { %v2402_v8 = vadd.f32 %v1367_v5, %v1350_v2  ;;  %v1309_v9 = vmax.f32 %v1080_v56, 0.0  ;;  %v1084_v10 = vadd.f32 %v1083_v46, %v2370_v26  ;;  %v2405_v44 = vpop.f32.mrf.mxu0  ;;  %v1351_v12 = vmul.f32 %v2385_v54, %v1308_v33 }
 0x359   :  { %2632 = vst [vmem:[#allocation6_spill] sm:$0xff] %v2405_v44  ;;  %v1085_v11 = vpop.f32.mrf.mxu1 }
 0x35a   :  { %2631 = vst [vmem:[#allocation5_spill] sm:$0xff] %v2402_v8  ;;  %v1368_v59 = vmul.f32 %v2390_v51, %v1309_v9  ;;  %v1311_v14 = vmax.f32 %v1084_v10, 0.0  ;;  %v1086_v3 = vadd.f32 %v1085_v11, %v2370_v26  ;;  %v2410_v15 = vpop.f32.mrf.mxu0 }
 0x35b   :  { %2633 = vst [vmem:[#allocation7_spill] sm:$0xff] %v2410_v15  ;;  %v1089_v4 = vpop.f32.mrf.mxu1 }
 0x35c   :  { %v2412_v6 = vadd.f32 %v1368_v59, %v1351_v12  ;;  %v1312_v28 = vmax.f32 %v1086_v3, 0.0  ;;  %v2414_v61 = vpop.f32.mrf.mxu0  ;;  %v1352_v19 = vmul.f32 %v2385_v54, %v1311_v14  ;;  %v2431_v10 = vadd.f32 %v1089_v4, %v2372_v42 }
 0x35d   :  { %v1091_v38 = vpop.f32.mrf.mxu1 }
 0x35e   :  { %2634 = vst [vmem:[#allocation8_spill] sm:$0xff] %v2412_v6  ;;  %v1369_v17 = vmul.f32 %v2390_v51, %v1312_v28  ;;  %v2418_v18 = vpop.f32.mrf.mxu0  ;;  %v2434_v11 = vadd.f32 %v1091_v38, %v2372_v42 }
 0x35f   :  { %2635 = vst [vmem:[#allocation9_spill] sm:$0xff] %v2418_v18  ;;  %v1095_v20 = vpop.f32.mrf.mxu1 }
 0x360   :  { %v2420_v21 = vadd.f32 %v1369_v17, %v1352_v19  ;;  %v2422_v55 = vpop.f32.mrf.mxu0  ;;  %v2442_v0 = vadd.f32 %v1095_v20, %v2366_v1 }
 0x361   :  { %v1097_v22 = vpop.f32.mrf.mxu1 }
 0x362   :  { %2636 = vst [vmem:[#allocation10_spill] sm:$0xff] %v2420_v21  ;;  %v2424_v29 = vpop.f32.mrf.mxu0  ;;  %v2445_v4 = vadd.f32 %v1097_v22, %v2366_v1 }
 0x363   :  { %v1101_v34 = vpop.f32.mrf.mxu1 }
 0x364   :  { %v1726_v23 = vpop.f32.mrf.mxu0  ;;  %v2448_v38 = vadd.f32 %v1101_v34, %v2368_v41 }
 0x365   :  { %v1103_v24 = vpop.f32.mrf.mxu1  ;;  %v2451_v43 = vadd.f32 %v1726_v23, %v2368_v41 }
 0x366   :  { %v2426_v25 = vpop.f32.mrf.mxu0  ;;  %v2437_v59 = vadd.f32 %v1103_v24, %v2368_v41 }
 0x367   :  { %v1107_v58 = vpop.f32.mrf.mxu1 }
 0x368   :  { %v1729_v47 = vpop.f32.mrf.mxu0  ;;  %v2455_v8 = vadd.f32 %v1107_v58, %v2362_v40 }
 0x369   :  { %v1109_v63 = vpop.f32.mrf.mxu1  ;;  %v2458_v28 = vadd.f32 %v1729_v47, %v2364_v27 }
 0x36a   :  { %v2428_v52 = vpop.f32.mrf.mxu0  ;;  %v2461_v20 = vadd.f32 %v1109_v63, %v2362_v40 }
 0x36b   :  { %v1113_v35 = vpop.f32.mrf.mxu1 }
 0x36c   :  { %v1732_v49 = vpop.f32.mrf.mxu0  ;;  %v2464_v22 = vadd.f32 %v1113_v35, %v2364_v27 }
 0x36d   :  { %v1115_v53 = vpop.f32.mrf.mxu1  ;;  %v2470_v58 = vadd.f32 %v1732_v49, %v2360_v39 }
 0x36e   :  { %v1270_v13 = vpop.f32.mrf.mxu0  ;;  %v1116_v47 = vadd.f32 %v1115_v53, %v2364_v27 }
 0x36f   :  { %v1119_v60 = vpop.f32.mrf.mxu1  ;;  %v2474_v24 = vadd.f32 %v1270_v13, %v2358_v37 }
 0x370   :  { %v1735_v56 = vpop.f32.mrf.mxu0 }
 0x371   :  { %v1121_v62 = vpop.f32.mrf.mxu1 }
 0x372   :  { %v1280_v9 = vpop.f32.mrf.mxu0 }
 0x373   :  { %v1125_v2 = vpop.f32.mrf.mxu1 }
 0x374   :  { %v1738_v3 = vpop.f32.mrf.mxu0 }
 0x375   :  { %v1127_v5 = vpop.f32.mrf.mxu1  ;;  %v1296_v63 = vadd.f32 %v1738_v3, %v2352_v31 }
 0x376   :  { %v1290_v34 = vpop.f32.mrf.mxu0  ;;  %v1128_v49 = vadd.f32 %v1127_v5, %v2360_v39 }
 0x377   :  { %v1131_v33 = vpop.f32.mrf.mxu1  ;;  %v1291_v16 = vadd.f32 %v1290_v34, %v2350_v30 }
 0x378   :  { %v1132_v27 = vadd.f32 %v1131_v33, %v2354_v32  ;;  %v1281_v33 = vadd.f32 %v1280_v9, %v2354_v32  ;;  %v1333_v34 = vmax.f32 %v1128_v49, 0.0 }
 0x379   :  { %v1133_v46 = vpop.f32.mrf.mxu1 }
 0x37a   :  { %v1134_v35 = vadd.f32 %v1133_v46, %v2354_v32  ;;  %v1286_v46 = vadd.f32 %v1735_v56, %v2356_v36 }
 0x37b   :  { %v1137_v12 = vpop.f32.mrf.mxu1 }
 0x37c   :  { %v1138_v15 = vadd.f32 %v1137_v12, %v2356_v36  ;;  %v1122_v12 = vadd.f32 %v1121_v62, %v2358_v37  ;;  %v1340_v62 = vmax.f32 %v1286_v46, 0.0  ;;  %v1326_v46 = vmax.f32 %v2464_v22, 0.0 }
 0x37d   :  { %v1139_v14 = vpop.f32.mrf.mxu1  ;;  %v1331_v22 = vmax.f32 %v2474_v24, 0.0 }
 0x37e   :  { %v1140_v6 = vadd.f32 %v1139_v14, %v2356_v36  ;;  %v1338_v18 = vmax.f32 %v1138_v15, 0.0  ;;  %v1357_v24 = vmul.f32 %v2385_v54, %v1326_v46 }
 0x37f   :  { %v1143_v17 = vpop.f32.mrf.mxu1 }
 0x380   :  { %v1144_v41 = vadd.f32 %v1143_v17, %v2350_v30  ;;  %v1339_v13 = vmax.f32 %v1140_v6, 0.0  ;;  %v1343_v6 = vmax.f32 %v1291_v16, 0.0  ;;  %v1361_v56 = vmul.f32 %v2385_v54, %v1338_v18 }
 0x381   :  { %v1145_v19 = vpop.f32.mrf.mxu1 }
 0x382   :  { %v1146_v23 = vadd.f32 %v1145_v19, %v2350_v30  ;;  %v1120_v19 = vadd.f32 %v1119_v60, %v2358_v37  ;;  %v1341_v44 = vmax.f32 %v1144_v41, 0.0  ;;  %v1336_v60 = vmax.f32 %v1134_v35, 0.0 }
 0x383   :  { %v1149_v21 = vpop.f32.mrf.mxu1  ;;  %v1335_v41 = vmax.f32 %v1132_v27, 0.0  ;;  %v1378_v36 = vmul.f32 %v2390_v51, %v1339_v13  ;;  %v1327_v35 = vmax.f32 %v1116_v47, 0.0 }
 0x384   :  { %v1342_v14 = vmax.f32 %v1146_v23, 0.0  ;;  %v1150_v17 = vadd.f32 %v1149_v21, %v2352_v31  ;;  %v1126_v21 = vadd.f32 %v1125_v2, %v2360_v39  ;;  %v1346_v23 = vmax.f32 %v1296_v63, 0.0 }
 0x385   :  { %v1151_v53 = vpop.f32.mrf.mxu1  ;;  %v1362_v37 = vmul.f32 %v2385_v54, %v1341_v44  ;;  %v1377_v16 = vmul.f32 %v2390_v51, %v1336_v60  ;;  %v1376_v44 = vmul.f32 %v2390_v51, %v1333_v34  ;;  %v1360_v27 = vmul.f32 %v2385_v54, %v1335_v41 }
 0x386   :  { %v1344_v3 = vmax.f32 %v1150_v17, 0.0  ;;  %v1152_v48 = vadd.f32 %v1151_v53, %v2352_v31  ;;  %v1379_v5 = vmul.f32 %v2390_v51, %v1342_v14  ;;  %v2493_v31 = vld [vmem:[%s2613_s0 + $0x20] sm:$0xff]  ;;  %v1332_v2 = vmax.f32 %v1126_v21, 0.0 }
 0x387   :  { %v1414_v32 = vmul.f32 %v2493_v31, %v1346_v23  ;;  %v1329_v14 = vmax.f32 %v1120_v19, 0.0  ;;  %v1337_v17 = vmax.f32 %v1281_v33, 0.0  ;;  %v1413_v49 = vmul.f32 %v2493_v31, %v1343_v6 }
 0x388   :  { %v1345_v30 = vmax.f32 %v1152_v48, 0.0  ;;  %v1363_v39 = vmul.f32 %v2385_v54, %v1344_v3  ;;  %v1330_v48 = vmax.f32 %v1122_v12, 0.0  ;;  %v1395_v9 = vadd.f32 %v1379_v5, %v1362_v37 }
 0x389   :  { %v1394_v53 = vadd.f32 %v1378_v36, %v1361_v56  ;;  %v1324_v3 = vmax.f32 %v2461_v20, 0.0  ;;  %v1334_v12 = vmax.f32 %v2470_v58, 0.0  ;;  %v1412_v18 = vmul.f32 %v2493_v31, %v1340_v62 }
 0x38a   :  { %v1380_v15 = vmul.f32 %v2390_v51, %v1345_v30  ;;  %v1375_v47 = vmul.f32 %v2390_v51, %v1330_v48  ;;  %v1359_v19 = vmul.f32 %v2385_v54, %v1332_v2  ;;  %v1393_v21 = vadd.f32 %v1377_v16, %v1360_v27 }
 0x38b   :  { %v1429_v23 = vadd.f32 %v1413_v49, %v1395_v9  ;;  %v1323_v60 = vmax.f32 %v2455_v8, 0.0  ;;  %v1261_v5 = vadd.f32 %v2428_v52, %v2362_v40  ;;  %v1374_v20 = vmul.f32 %v2390_v51, %v1327_v35 }
 0x38c   :  { %v1396_v63 = vadd.f32 %v1380_v15, %v1363_v39  ;;  %v2637_v30 = vmov 0.0   ;;  %v1358_v58 = vmul.f32 %v2385_v54, %v1329_v14  ;;  %v1411_v33 = vmul.f32 %v2493_v31, %v1337_v17 }
 0x38d   :  { %v1392_v34 = vadd.f32 %v1376_v44, %v1359_v19  ;;  %v1428_v6 = vadd.f32 %v1412_v18, %v1394_v53  ;;  %v1320_v41 = vmax.f32 %v2448_v38, 0.0  ;;  %v1251_v8 = vadd.f32 %v2426_v25, %v2366_v1 }
 0x38e   :  { %v1430_v13 = vadd.f32 %v1414_v32, %v1396_v63  ;;  %v1328_v40 = vmax.f32 %v2458_v28, 0.0  ;;  %v1373_v52 = vmul.f32 %v2390_v51, %v1324_v3  ;;  %v1410_v36 = vmul.f32 %v2493_v31, %v1334_v12  ;;  %v868_v3 = vpop.permute.xlu1 %867 }
 0x38f   :  { %v1391_v37 = vadd.f32 %v1375_v47, %v1358_v58  ;;  %v1427_v39 = vadd.f32 %v1411_v33, %v1393_v21  ;;  %v1246_v15 = vadd.f32 %v2422_v55, %v2372_v42  ;;  %v1318_v38 = vmax.f32 %v2445_v4, 0.0  ;;  %v873_v4 = vpop.permute.xlu0 %872  ;;  %v2643_v21 = vld [vmem:[#allocation6_spill] sm:$0xff]  ;;  %v2644_v58 = vld [vmem:[#allocation3_spill] sm:$0xff] }
 0x390   :  { %1740 = vmatpush3.msra.mxu0 %v1430_v13  ;;  %v2638_v1 = vmax.f32 %v2437_v59, 0.0  ;;  %v1356_v28 = vmul.f32 %v2385_v54, %v1323_v60  ;;  %v1325_v62 = vmax.f32 %v1261_v5, 0.0  ;;  %v1390_v48 = vadd.f32 %v1374_v20, %v1357_v24 }
 0x391   :  { %1741 = vmatprep.subr.mxu0 %v2637_v30  ;;  %v1409_v2 = vmul.f32 %v2493_v31, %v1331_v22  ;;  %v1426_v32 = vadd.f32 %v1410_v36, %v1392_v34  ;;  %v1317_v16 = vmax.f32 %v2442_v0, 0.0  ;;  %v1241_v42 = vadd.f32 %v2424_v29, %v2370_v26 }
 0x392   :  { %1742 = vmatpush3.msra.mxu0 %v1429_v23  ;;  %v1372_v25 = vmul.f32 %v2390_v51, %v2638_v1  ;;  %v1355_v55 = vmul.f32 %v2385_v54, %v1320_v41  ;;  %v1322_v59 = vmax.f32 %v2451_v43, 0.0  ;;  %v1319_v56 = vmax.f32 %v1251_v8, 0.0 }
 0x393   :  { %1743 = vmatprep.subr.mxu0 %v2637_v30  ;;  %v1408_v9 = vmul.f32 %v2493_v31, %v1328_v40  ;;  %v1389_v63 = vadd.f32 %v1373_v52, %v1356_v28  ;;  %v1425_v35 = vadd.f32 %v1409_v2, %v1391_v37  ;;  %v1068_v14 = vadd.f32 %v2399_v7, %v873_v4 }
 0x394   :  { %1744 = vmatpush3.msra.mxu0 %v1428_v6  ;;  %v1236_v0 = vadd.f32 %v2414_v61, %v2392_v50  ;;  %v2639_v26 = vmax.f32 %v2434_v11, 0.0  ;;  %v1316_v17 = vmax.f32 %v1246_v15, 0.0  ;;  %v1371_v43 = vmul.f32 %v2390_v51, %v1318_v38  ;;  %v2641_v61 = vld [vmem:[#allocation9_spill] sm:$0xff]  ;;  %v2645_v6 = vld [vmem:[#allocation7_spill] sm:$0xff] }
 0x395   :  { %1745 = vmatprep.subr.mxu0 %v2637_v30  ;;  %v1388_v44 = vadd.f32 %v1372_v25, %v1355_v55  ;;  %v1407_v49 = vmul.f32 %v2493_v31, %v1325_v62  ;;  %v1424_v27 = vadd.f32 %v1408_v9, %v1390_v48  ;;  %v1066_v53 = vadd.f32 %v2394_v57, %v873_v4  ;;  %v2642_v57 = vld [vmem:[#allocation4_spill] sm:$0xff]  ;;  %v2646_v62 = vld [vmem:[#allocation10_spill] sm:$0xff] }
 0x396   :  { %1746 = vmatpush3.msra.mxu0 %v1427_v39  ;;  %v1370_v29 = vmul.f32 %v2390_v51, %v2639_v26  ;;  %v2640_v7 = vmax.f32 %v2431_v10, 0.0  ;;  %v1231_v11 = vadd.f32 %v2641_v61, %v2374_v45  ;;  %v1354_v13 = vmul.f32 %v2385_v54, %v1317_v16  ;;  %v1432_v26 = vld [vmem:[%s2617_s10] sm:$0xff] }
 0x397   :  { %1747 = vmatprep.subr.mxu0 %v2637_v30  ;;  %v1313_v46 = vmax.f32 %v1241_v42, 0.0  ;;  %v1406_v12 = vmul.f32 %v2493_v31, %v1322_v59  ;;  %v1405_v18 = vmul.f32 %v2493_v31, %v1319_v56  ;;  %v1423_v47 = vadd.f32 %v1407_v49, %v1389_v63  ;;  %v2647_v42 = vld [vmem:[#allocation8_spill] sm:$0xff]  ;;  %v2648_v56 = vld [vmem:[#allocation5_spill] sm:$0xff] }
 0x398   :  { %1748 = vmatpush3.msra.mxu0 %v1426_v32  ;;  %v1353_v50 = vmul.f32 %v2385_v54, %v2640_v7  ;;  %v1062_v19 = vadd.f32 %v2642_v57, %v868_v3  ;;  %v1303_v10 = vmax.f32 %v1068_v14, 0.0  ;;  %v1226_v23 = vadd.f32 %v2643_v21, %v873_v4 }
 0x399   :  { %1749 = vmatprep.subr.mxu0 %v2637_v30  ;;  %v1310_v60 = vmax.f32 %v1236_v0, 0.0  ;;  %v1404_v5 = vmul.f32 %v2493_v31, %v1316_v17  ;;  %v1387_v20 = vadd.f32 %v1371_v43, %v1354_v13  ;;  %v1422_v22 = vadd.f32 %v1406_v12, %v1388_v44  ;;  %v2649_v43 = vld [vmem:[#allocation2_spill] sm:$0xff] }
 0x39a   :  { %1750 = vmatpush3.msra.mxu0 %v1425_v35  ;;  %v1386_v45 = vadd.f32 %v1370_v29, %v1353_v50  ;;  %v1060_v33 = vadd.f32 %v2644_v58, %v868_v3  ;;  %v1302_v34 = vmax.f32 %v1066_v53, 0.0  ;;  %v1221_v41 = vadd.f32 %v2645_v6, %v868_v3 }
 0x39b   :  { %1751 = vmatprep.subr.mxu0 %v2637_v30  ;;  %v1307_v8 = vmax.f32 %v1231_v11, 0.0  ;;  %v1403_v40 = vmul.f32 %v2493_v31, %v1313_v46  ;;  %v1421_v52 = vadd.f32 %v1405_v18, %v1387_v20  ;;  %v1300_v24 = vmax.f32 %v1062_v19, 0.0 }
 0x39c   :  { %1752 = vmatpush3.msra.mxu0 %v1424_v27  ;;  %v1366_v36 = vmul.f32 %v2390_v51, %v1303_v10  ;;  %v1304_v37 = vmax.f32 %v1226_v23, 0.0  ;;  %v1402_v39 = vmul.f32 %v2493_v31, %v1310_v60  ;;  %v1420_v15 = vadd.f32 %v1404_v5, %v1386_v45 }
 0x39d   :  { %1753 = vmatprep.subr.mxu0 %v2637_v30  ;;  %v1299_v38 = vmax.f32 %v1060_v33, 0.0  ;;  %v1349_v1 = vmul.f32 %v2385_v54, %v1302_v34  ;;  %v1301_v25 = vmax.f32 %v1221_v41, 0.0  ;;  %v1401_v28 = vmul.f32 %v2493_v31, %v1307_v8 }
 0x39e   :  { %1754 = vmatpush3.msra.mxu0 %v1423_v47  ;;  %v1419_v48 = vadd.f32 %v1403_v40, %v2646_v62  ;;  %v1365_v2 = vmul.f32 %v2390_v51, %v1300_v24  ;;  %v1400_v16 = vmul.f32 %v2493_v31, %v1304_v37  ;;  %v1418_v55 = vadd.f32 %v1402_v39, %v2647_v42 }
 0x39f   :  { %1755 = vmatprep.subr.mxu0 %v2637_v30  ;;  %v1382_v32 = vadd.f32 %v1366_v36, %v1349_v1  ;;  %v1348_v59 = vmul.f32 %v2385_v54, %v1299_v38  ;;  %v1399_v4 = vmul.f32 %v2493_v31, %v1301_v25  ;;  %v1417_v9 = vadd.f32 %v1401_v28, %v2648_v56 }
 0x3a0   :  { %1756 = vmatpush3.msra.mxu0 %v1422_v22  ;;  %v1397_v63 = vadd.f32 %v2390_v51, %v2385_v54  ;;  %v1504_v54 = vld [vmem:[%s2618_s11] sm:$0xff]  ;;  %v55_v51 = vpop.permute.xlu0 %54 }
 0x3a1   :  { %1757 = vmatprep.subr.mxu0 %v2637_v30  ;;  %v1381_v35 = vadd.f32 %v1365_v2, %v1348_v59  ;;  %v1416_v14 = vadd.f32 %v1400_v16, %v1382_v32 }
 0x3a2   :  { %1758 = vmatpush3.msra.mxu0 %v1421_v52  ;;  %v1431_v29 = vadd.f32 %v2493_v31, %v1397_v63  ;;  %v128_v31 = vadd.f32 %v2649_v43, %v55_v51 }
 0x3a3   :  { %1759 = vmatprep.subr.mxu0 %v2637_v30  ;;  %v1415_v0 = vadd.f32 %v1399_v4, %v1381_v35 }
 0x3a4   :  { %1760 = vmatpush3.msra.mxu0 %v1420_v15 }
 0x3a5   :  { %1761 = vmatprep.subr.mxu0 %v2637_v30 }
 0x3a6   :  { %1762 = vmatpush3.msra.mxu0 %v1419_v48 }
 0x3a7   :  { %1763 = vmatprep.subr.mxu0 %v2637_v30 }
 0x3a8   :  { %1764 = vmatpush3.msra.mxu0 %v1418_v55 }
 0x3a9   :  { %1765 = vmatprep.subr.mxu0 %v2637_v30 }
 0x3aa   :  { %1766 = vmatpush3.msra.mxu0 %v1417_v9 }
 0x3ab   :  { %1767 = vmatprep.subr.mxu0 %v2637_v30 }
 0x3ac   :  { %1768 = vmatpush3.msra.mxu0 %v1416_v14 }
 0x3ad   :  { %1769 = vmatprep.subr.mxu0 %v2637_v30 }
 0x3ae   :  { %1770 = vmatpush3.msra.mxu0 %v1415_v0 }
 0x3af   :  { %1772 = vmatmul.mubr.f32.vlgmr.msra.gmra.mxu0 %v1432_v26  ;;  %1774 = vmatprep.subr.mxu0 %v2637_v30 }
 0x3b0   :  { %1775 = vmatpush3.msra.mxu0 %v1431_v29  ;;  %1776 = vmatprep.mubr.msk.f32.mxu0 %vm1820_vm1, %v2637_v30 }
 0x3b3   :  { %1777 = vmatmul.mubr.msk.f32.vlgmr.msra.gmra.mxu0 %vm57_vm0, %v1504_v54 }
 0x46f   :  { %v1499_v17 = vpop.f32.mrf.mxu0 }
 0x470   :  { %v1503_v49 = vadd.f32 %v1499_v17, %v128_v31 }
 0x471   :  { %v1773_v44 = vpop.f32.mrf.mxu0 }
 0x473   :  { %v1574_v27 = vpop.f32.mrf.mxu0 }
 0x474   :  { %v1578_v53 = vadd.f32 %v1574_v27, %v1503_v49 }
 0x475   :  { %v1778_v7 = vpop.f32.mrf.mxu0 }
 0x476   :  { %vm1579_vm14 = vcmp.ge.f32.partialorder %v1578_v53, 0.0  ;;  %v1580_v50 = vmul.f32 0.1, %v1578_v53 }
 0x478   :  { %v1581_v61 = vsel %vm1579_vm14, %v1578_v53, %v1580_v50 }
 0x479   :  { %1582 = vst [vmem:[%s2619_s14] sm:$0xff] %v1581_v61 }

</bundles_post_ra>
